<compile_context>
chip_gen: v6e
topology: v6e:2x2x1
jax: 0.10.0
libtpu: 0.0.40
codegen_flags: <defaults>
</compile_context>

<pallas_src>
import functools

import jax
import jax.numpy as jnp
from jax.experimental import pallas as pl
from jax.experimental.pallas import tpu as pltpu

D_PAD = 128            # padded channel width (lane-dense)
NEG_SLOPE = 0.2        # PyG GATConv default LeakyReLU slope
NEG_INF = -1e30        # additive adjacency bias for non-edges


def _gat_fused_kernel(adjb_ref, x_ref, w_ref, sp_ref, o_ref, *,
                      num_layers, negative_slope, dst_cols):
    x = x_ref[...]                                   # [N, D_PAD] bf16
    for l in range(num_layers):                      # static unroll (small L)
        c = dst_cols[l]                              # column holding folded att_dst
        # feature transform on the MXU (bf16 operands, f32 accumulate);
        # column c of h is <h_i, att_dst> for free (folded on the host).
        h = jnp.dot(x, w_ref[l], preferred_element_type=jnp.float32)   # [N, D_PAD]
        h_b = h.astype(jnp.bfloat16)

        sp = sp_ref[l]                               # [8, D_PAD] f32 (merged params)
        asrc_b = sp[0:1, :].astype(jnp.bfloat16)     # [1, D_PAD]  att_src
        bias = sp[1:2, :]                            # [1, D_PAD]  bias (f32)

        s_dst = h[:, c:c + 1]                        # [N, 1]  (free column slice)
        s_src = jax.lax.dot_general(                 # [1, N]
            asrc_b, h_b, dimension_numbers=(((1,), (1,)), ((), ())),
            preferred_element_type=jnp.float32)

        e = s_dst + s_src                            # [N, N]
        e = jnp.maximum(e, negative_slope * e)       # LeakyReLU (slope < 1)
        e = e + adjb_ref[...].astype(jnp.float32)    # additive mask (0 / -1e30)

        # row-wise softmax over neighbors; self loop => finite row max, so the
        # -1e30 masked entries underflow to exactly 0 after exp.
        e = e - jnp.max(e, axis=-1, keepdims=True)
        p = jnp.exp(e)
        r = pl.reciprocal(jnp.sum(p, axis=-1, keepdims=True), approx=True)  # EUP

        # aggregate (the N^2 matmul, d_out-wide), deferred normalization, bias
        out = jnp.dot(p.astype(jnp.bfloat16), h_b,
                      preferred_element_type=jnp.float32) * r + bias

        if l < num_layers - 1:                       # ELU between layers
            out = jnp.where(out > 0.0, out,
                            jnp.exp(jnp.minimum(out, 0.0)) - 1.0)
        x = out.astype(jnp.bfloat16)
    o_ref[...] = x.astype(o_ref.dtype)               # lane-dense bf16 store


def gat_forward(x, adj_mask, params):
    """Fused forward pass.  x: [N, in_ch] f32, adj_mask: [N, N] {0,1} f32
    (self loops included), params: list of (W [din,dout], att_src [1,dout],
    att_dst [1,dout], bias [1,dout])."""
    n = x.shape[0]
    num_layers = len(params)
    out_ch = params[-1][0].shape[1]

    def pad2(a, r, c, dtype):
        z = jnp.zeros((r, c), dtype)
        return z.at[:a.shape[0], :a.shape[1]].set(a.astype(dtype))

    # big operands in bf16 from the host
    x_pad = pad2(x, n, D_PAD, jnp.bfloat16)

    w_list, sp_list, dst_cols = [], [], []
    for (w, a_src, a_dst, b) in params:
        din, dout = w.shape
        assert dout < D_PAD, "need a spare padded column to fold att_dst into W"
        wp = jnp.zeros((D_PAD, D_PAD), jnp.float32)
        wp = wp.at[:din, :dout].set(w)
        # fold att_dst into column `dout`: h[:, dout] = x @ (W @ att_dst^T).
        # Harmless extra column: next layer's W rows >= dout are zero and the
        # final output is sliced to out_ch.
        wp = wp.at[:din, dout].set(jnp.dot(w, a_dst.T)[:, 0])
        w_list.append(wp.astype(jnp.bfloat16))
        dst_cols.append(dout)
        sp = jnp.zeros((8, D_PAD), jnp.float32)      # row 0: att_src, row 1: bias
        sp = sp.at[0, :dout].set(a_src[0])
        sp = sp.at[1, :dout].set(b[0])
        sp_list.append(sp)
    w_stack = jnp.stack(w_list)                       # [L, D_PAD, D_PAD] bf16
    sp_stack = jnp.stack(sp_list)                     # [L, 8, D_PAD]     f32

    # adjacency as additive bias: 0 on edges/self-loops, -1e30 elsewhere (bf16)
    adj_bias = jnp.where(adj_mask > 0.0, 0.0, NEG_INF).astype(jnp.bfloat16)

    kernel = functools.partial(_gat_fused_kernel, num_layers=num_layers,
                               negative_slope=NEG_SLOPE,
                               dst_cols=tuple(dst_cols))
    out_pad = pl.pallas_call(
        kernel,
        out_shape=jax.ShapeDtypeStruct((n, D_PAD), jnp.bfloat16),
        in_specs=[
            pl.BlockSpec((n, n), lambda: (0, 0)),
            pl.BlockSpec((n, D_PAD), lambda: (0, 0)),
            pl.BlockSpec((num_layers, D_PAD, D_PAD), lambda: (0, 0, 0)),
            pl.BlockSpec((num_layers, 8, D_PAD), lambda: (0, 0, 0)),
        ],
        out_specs=pl.BlockSpec((n, D_PAD), lambda: (0, 0)),
        # resident footprint is well under 1 MiB; 8 MiB leaves headroom for
        # compiler scratch / spills without reserving the blanket 32 MiB.
        compiler_params=pltpu.CompilerParams(vmem_limit_bytes=8 * 1024 * 1024),
    )(adj_bias, x_pad, w_stack, sp_stack)
    return out_pad[:, :out_ch].astype(jnp.float32)


def gat_reference(x, adj_mask, params):
    """Pure-JAX reference with the same numerics policy (bf16 MXU operands,
    f32 accumulation, deferred softmax normalization)."""
    num_layers = len(params)
    for l, (w, a_src, a_dst, b) in enumerate(params):
        x_b = x.astype(jnp.bfloat16)
        h = jnp.dot(x_b, w.astype(jnp.bfloat16),
                    preferred_element_type=jnp.float32)
        h_b = h.astype(jnp.bfloat16)
        w_dst = jnp.dot(w, a_dst.T).astype(jnp.bfloat16)            # [din, 1]
        s_dst = jnp.dot(x_b, w_dst, preferred_element_type=jnp.float32)  # [N, 1]
        s_src = jax.lax.dot_general(
            a_src.astype(jnp.bfloat16), h_b,
            dimension_numbers=(((1,), (1,)), ((), ())),
            preferred_element_type=jnp.float32)                     # [1, N]
        e = s_dst + s_src
        e = jnp.maximum(e, NEG_SLOPE * e)
        e = jnp.where(adj_mask > 0.0, e, jnp.float32(NEG_INF))
        e = e - jnp.max(e, axis=-1, keepdims=True)
        p = jnp.exp(e)
        r = 1.0 / jnp.sum(p, axis=-1, keepdims=True)
        out = jnp.dot(p.astype(jnp.bfloat16), h_b,
                      preferred_element_type=jnp.float32) * r + b
        if l < num_layers - 1:
            out = jnp.where(out > 0.0, out, jnp.exp(jnp.minimum(out, 0.0)) - 1.0)
        x = out
    return x


def init_gat_params(key, in_channels, hidden_channels, out_channels, num_layers):
    """Deterministic GATConv params (heads=1): W [din,dout], att_src/att_dst
    [1,dout], bias [1,dout]."""
    dims = [in_channels] + [hidden_channels] * (num_layers - 1) + [out_channels]
    params = []
    for l in range(num_layers):
        din, dout = dims[l], dims[l + 1]
        key, kw, ks, kd, kb = jax.random.split(key, 5)
        lim_w = jnp.sqrt(6.0 / (din + dout))
        w = jax.random.uniform(kw, (din, dout), jnp.float32, -lim_w, lim_w)
        lim_a = jnp.sqrt(6.0 / (dout + 1))
        att_src = jax.random.uniform(ks, (1, dout), jnp.float32, -lim_a, lim_a)
        att_dst = jax.random.uniform(kd, (1, dout), jnp.float32, -lim_a, lim_a)
        b = 0.1 * jax.random.normal(kb, (1, dout), jnp.float32)
        params.append((w, att_src, att_dst, b))
    return params


def build_adjacency_mask(key, n, p=0.1):
    """Random undirected adjacency as a dense {0,1} mask, with self loops
    (GATConv add_self_loops=True)."""
    a = (jax.random.uniform(key, (n, n)) < p).astype(jnp.float32)
    a = jnp.maximum(a, a.T)
    a = jnp.maximum(a, jnp.eye(n, dtype=jnp.float32))
    return a


if __name__ == "__main__":
    # small, TPU-friendly shapes (N=128 keeps every 2-D operand (8,128)-tiled)
    N = 128
    IN_CH = 16
    HIDDEN = 32
    OUT_CH = 8
    NUM_LAYERS = 3
    # att_heads=1 (module default), dropout irrelevant in eval, apply_batchnorm=False

    key = jax.random.PRNGKey(0)
    k_x, k_adj, k_par = jax.random.split(key, 3)

    x = jax.random.normal(k_x, (N, IN_CH), jnp.float32)
    adj_mask = build_adjacency_mask(k_adj, N)
    params = init_gat_params(k_par, IN_CH, HIDDEN, OUT_CH, NUM_LAYERS)

    out = gat_forward(x, adj_mask, params)
    out = jax.block_until_ready(out)

    ref = gat_reference(x, adj_mask, params)
    assert out.shape == (N, OUT_CH)
    assert jnp.allclose(out, ref, atol=2e-2, rtol=2e-2), (
        float(jnp.max(jnp.abs(out - ref))))

    print("KERNEL_OK")
</pallas_src>

<mosaic_0001>
module attributes {stable_mosaic.version = 11 : i64} {
  func.func @_gat_fused_kernel(%arg0: memref<128x128xbf16, #tpu.memory_space<vmem>>, %arg1: memref<128x128xbf16, #tpu.memory_space<vmem>>, %arg2: memref<3x128x128xbf16, #tpu.memory_space<vmem>>, %arg3: memref<3x8x128xf32, #tpu.memory_space<vmem>>, %arg4: memref<128x128xbf16, #tpu.memory_space<vmem>>) attributes {dimension_semantics = [], scalar_prefetch = 0 : i64, scratch_operands = 0 : i64, tpu.core_type = #tpu.core_type<tc>} {
    %c0 = arith.constant 0 : index
    %c0_0 = arith.constant 0 : index
    %0 = vector.load %arg1[%c0, %c0_0] : memref<128x128xbf16, #tpu.memory_space<vmem>>, vector<128x128xbf16>
    %c0_1 = arith.constant 0 : index
    %c0_2 = arith.constant 0 : index
    %c0_3 = arith.constant 0 : index
    %1 = vector.load %arg2[%c0_1, %c0_2, %c0_3] : memref<3x128x128xbf16, #tpu.memory_space<vmem>>, vector<1x128x128xbf16>
    %2 = vector.shape_cast %1 : vector<1x128x128xbf16> to vector<128x128xbf16>
    %cst = arith.constant dense<0.000000e+00> : vector<128x128xf32>
    %3 = tpu.matmul %0, %2, %cst {dimension_numbers = #tpu.dot_dimension_numbers<[1], [0], [0], [1], [0, 0, 1, 1], [], []>} : vector<128x128xbf16>, vector<128x128xbf16>, vector<128x128xf32> -> vector<128x128xf32>
    %4 = arith.truncf %3 : vector<128x128xf32> to vector<128x128xbf16>
    %c0_4 = arith.constant 0 : index
    %c0_5 = arith.constant 0 : index
    %c0_6 = arith.constant 0 : index
    %5 = vector.load %arg3[%c0_4, %c0_5, %c0_6] : memref<3x8x128xf32, #tpu.memory_space<vmem>>, vector<1x8x128xf32>
    %6 = vector.shape_cast %5 : vector<1x8x128xf32> to vector<8x128xf32>
    %7 = vector.extract_strided_slice %6 {offsets = [0, 0], sizes = [1, 128], strides = [1, 1]} : vector<8x128xf32> to vector<1x128xf32>
    %8 = arith.truncf %7 : vector<1x128xf32> to vector<1x128xbf16>
    %9 = vector.extract_strided_slice %6 {offsets = [1, 0], sizes = [1, 128], strides = [1, 1]} : vector<8x128xf32> to vector<1x128xf32>
    %10 = vector.extract_strided_slice %3 {offsets = [0, 32], sizes = [128, 1], strides = [1, 1]} : vector<128x128xf32> to vector<128x1xf32>
    %cst_7 = arith.constant dense<0.000000e+00> : vector<1x128xf32>
    %11 = tpu.matmul %8, %4, %cst_7 {dimension_numbers = #tpu.dot_dimension_numbers<[1], [1], [0], [0], [0, 0, 1, 0], [], []>} : vector<1x128xbf16>, vector<128x128xbf16>, vector<1x128xf32> -> vector<1x128xf32>
    %12 = vector.broadcast %10 : vector<128x1xf32> to vector<128x128xf32>
    %13 = vector.broadcast %11 : vector<1x128xf32> to vector<128x128xf32>
    %14 = arith.addf %12, %13 : vector<128x128xf32>
    %cst_8 = arith.constant 2.000000e-01 : f32
    %15 = vector.broadcast %cst_8 : f32 to vector<128x128xf32>
    %16 = arith.mulf %15, %14 : vector<128x128xf32>
    %17 = arith.maximumf %14, %16 : vector<128x128xf32>
    %c0_9 = arith.constant 0 : index
    %c0_10 = arith.constant 0 : index
    %18 = vector.load %arg0[%c0_9, %c0_10] : memref<128x128xbf16, #tpu.memory_space<vmem>>, vector<128x128xbf16>
    %19 = arith.extf %18 : vector<128x128xbf16> to vector<128x128xf32>
    %20 = arith.addf %17, %19 : vector<128x128xf32>
    %cst_11 = arith.constant dense<0xFF800000> : vector<128xf32>
    %21 = vector.multi_reduction <maximumf>, %20, %cst_11 [1] : vector<128x128xf32> to vector<128xf32>
    %22 = vector.shape_cast %21 : vector<128xf32> to vector<128x1xf32>
    %23 = vector.broadcast %22 : vector<128x1xf32> to vector<128x128xf32>
    %24 = arith.subf %20, %23 : vector<128x128xf32>
    %25 = math.exp %24 : vector<128x128xf32>
    %cst_12 = arith.constant dense<0.000000e+00> : vector<128xf32>
    %26 = vector.multi_reduction <add>, %25, %cst_12 [1] : vector<128x128xf32> to vector<128xf32>
    %27 = vector.shape_cast %26 : vector<128xf32> to vector<128x1xf32>
    %28 = tpu.reciprocal %27 {approx = true} : vector<128x1xf32> -> vector<128x1xf32>
    %29 = arith.truncf %25 : vector<128x128xf32> to vector<128x128xbf16>
    %cst_13 = arith.constant dense<0.000000e+00> : vector<128x128xf32>
    %30 = tpu.matmul %29, %4, %cst_13 {dimension_numbers = #tpu.dot_dimension_numbers<[1], [0], [0], [1], [0, 0, 1, 1], [], []>} : vector<128x128xbf16>, vector<128x128xbf16>, vector<128x128xf32> -> vector<128x128xf32>
    %31 = vector.broadcast %28 : vector<128x1xf32> to vector<128x128xf32>
    %32 = arith.mulf %30, %31 : vector<128x128xf32>
    %33 = vector.broadcast %9 : vector<1x128xf32> to vector<128x128xf32>
    %34 = arith.addf %32, %33 : vector<128x128xf32>
    %cst_14 = arith.constant 0.000000e+00 : f32
    %35 = vector.broadcast %cst_14 : f32 to vector<128x128xf32>
    %36 = arith.cmpf ogt, %34, %35 : vector<128x128xf32>
    %cst_15 = arith.constant 0.000000e+00 : f32
    %37 = vector.broadcast %cst_15 : f32 to vector<128x128xf32>
    %38 = arith.minimumf %34, %37 : vector<128x128xf32>
    %39 = math.exp %38 : vector<128x128xf32>
    %cst_16 = arith.constant 1.000000e+00 : f32
    %40 = vector.broadcast %cst_16 : f32 to vector<128x128xf32>
    %41 = arith.subf %39, %40 : vector<128x128xf32>
    %42 = arith.select %36, %34, %41 : vector<128x128xi1>, vector<128x128xf32>
    %43 = arith.truncf %42 : vector<128x128xf32> to vector<128x128xbf16>
    %c1 = arith.constant 1 : index
    %c0_17 = arith.constant 0 : index
    %c0_18 = arith.constant 0 : index
    %44 = vector.load %arg2[%c1, %c0_17, %c0_18] : memref<3x128x128xbf16, #tpu.memory_space<vmem>>, vector<1x128x128xbf16>
    %45 = vector.shape_cast %44 : vector<1x128x128xbf16> to vector<128x128xbf16>
    %cst_19 = arith.constant dense<0.000000e+00> : vector<128x128xf32>
    %46 = tpu.matmul %43, %45, %cst_19 {dimension_numbers = #tpu.dot_dimension_numbers<[1], [0], [0], [1], [0, 0, 1, 1], [], []>} : vector<128x128xbf16>, vector<128x128xbf16>, vector<128x128xf32> -> vector<128x128xf32>
    %47 = arith.truncf %46 : vector<128x128xf32> to vector<128x128xbf16>
    %c1_20 = arith.constant 1 : index
    %c0_21 = arith.constant 0 : index
    %c0_22 = arith.constant 0 : index
    %48 = vector.load %arg3[%c1_20, %c0_21, %c0_22] : memref<3x8x128xf32, #tpu.memory_space<vmem>>, vector<1x8x128xf32>
    %49 = vector.shape_cast %48 : vector<1x8x128xf32> to vector<8x128xf32>
    %50 = vector.extract_strided_slice %49 {offsets = [0, 0], sizes = [1, 128], strides = [1, 1]} : vector<8x128xf32> to vector<1x128xf32>
    %51 = arith.truncf %50 : vector<1x128xf32> to vector<1x128xbf16>
    %52 = vector.extract_strided_slice %49 {offsets = [1, 0], sizes = [1, 128], strides = [1, 1]} : vector<8x128xf32> to vector<1x128xf32>
    %53 = vector.extract_strided_slice %46 {offsets = [0, 32], sizes = [128, 1], strides = [1, 1]} : vector<128x128xf32> to vector<128x1xf32>
    %cst_23 = arith.constant dense<0.000000e+00> : vector<1x128xf32>
    %54 = tpu.matmul %51, %47, %cst_23 {dimension_numbers = #tpu.dot_dimension_numbers<[1], [1], [0], [0], [0, 0, 1, 0], [], []>} : vector<1x128xbf16>, vector<128x128xbf16>, vector<1x128xf32> -> vector<1x128xf32>
    %55 = vector.broadcast %53 : vector<128x1xf32> to vector<128x128xf32>
    %56 = vector.broadcast %54 : vector<1x128xf32> to vector<128x128xf32>
    %57 = arith.addf %55, %56 : vector<128x128xf32>
    %cst_24 = arith.constant 2.000000e-01 : f32
    %58 = vector.broadcast %cst_24 : f32 to vector<128x128xf32>
    %59 = arith.mulf %58, %57 : vector<128x128xf32>
    %60 = arith.maximumf %57, %59 : vector<128x128xf32>
    %c0_25 = arith.constant 0 : index
    %c0_26 = arith.constant 0 : index
    %61 = vector.load %arg0[%c0_25, %c0_26] : memref<128x128xbf16, #tpu.memory_space<vmem>>, vector<128x128xbf16>
    %62 = arith.extf %61 : vector<128x128xbf16> to vector<128x128xf32>
    %63 = arith.addf %60, %62 : vector<128x128xf32>
    %cst_27 = arith.constant dense<0xFF800000> : vector<128xf32>
    %64 = vector.multi_reduction <maximumf>, %63, %cst_27 [1] : vector<128x128xf32> to vector<128xf32>
    %65 = vector.shape_cast %64 : vector<128xf32> to vector<128x1xf32>
    %66 = vector.broadcast %65 : vector<128x1xf32> to vector<128x128xf32>
    %67 = arith.subf %63, %66 : vector<128x128xf32>
    %68 = math.exp %67 : vector<128x128xf32>
    %cst_28 = arith.constant dense<0.000000e+00> : vector<128xf32>
    %69 = vector.multi_reduction <add>, %68, %cst_28 [1] : vector<128x128xf32> to vector<128xf32>
    %70 = vector.shape_cast %69 : vector<128xf32> to vector<128x1xf32>
    %71 = tpu.reciprocal %70 {approx = true} : vector<128x1xf32> -> vector<128x1xf32>
    %72 = arith.truncf %68 : vector<128x128xf32> to vector<128x128xbf16>
    %cst_29 = arith.constant dense<0.000000e+00> : vector<128x128xf32>
    %73 = tpu.matmul %72, %47, %cst_29 {dimension_numbers = #tpu.dot_dimension_numbers<[1], [0], [0], [1], [0, 0, 1, 1], [], []>} : vector<128x128xbf16>, vector<128x128xbf16>, vector<128x128xf32> -> vector<128x128xf32>
    %74 = vector.broadcast %71 : vector<128x1xf32> to vector<128x128xf32>
    %75 = arith.mulf %73, %74 : vector<128x128xf32>
    %76 = vector.broadcast %52 : vector<1x128xf32> to vector<128x128xf32>
    %77 = arith.addf %75, %76 : vector<128x128xf32>
    %cst_30 = arith.constant 0.000000e+00 : f32
    %78 = vector.broadcast %cst_30 : f32 to vector<128x128xf32>
    %79 = arith.cmpf ogt, %77, %78 : vector<128x128xf32>
    %cst_31 = arith.constant 0.000000e+00 : f32
    %80 = vector.broadcast %cst_31 : f32 to vector<128x128xf32>
    %81 = arith.minimumf %77, %80 : vector<128x128xf32>
    %82 = math.exp %81 : vector<128x128xf32>
    %cst_32 = arith.constant 1.000000e+00 : f32
    %83 = vector.broadcast %cst_32 : f32 to vector<128x128xf32>
    %84 = arith.subf %82, %83 : vector<128x128xf32>
    %85 = arith.select %79, %77, %84 : vector<128x128xi1>, vector<128x128xf32>
    %86 = arith.truncf %85 : vector<128x128xf32> to vector<128x128xbf16>
    %c2 = arith.constant 2 : index
    %c0_33 = arith.constant 0 : index
    %c0_34 = arith.constant 0 : index
    %87 = vector.load %arg2[%c2, %c0_33, %c0_34] : memref<3x128x128xbf16, #tpu.memory_space<vmem>>, vector<1x128x128xbf16>
    %88 = vector.shape_cast %87 : vector<1x128x128xbf16> to vector<128x128xbf16>
    %cst_35 = arith.constant dense<0.000000e+00> : vector<128x128xf32>
    %89 = tpu.matmul %86, %88, %cst_35 {dimension_numbers = #tpu.dot_dimension_numbers<[1], [0], [0], [1], [0, 0, 1, 1], [], []>} : vector<128x128xbf16>, vector<128x128xbf16>, vector<128x128xf32> -> vector<128x128xf32>
    %90 = arith.truncf %89 : vector<128x128xf32> to vector<128x128xbf16>
    %c2_36 = arith.constant 2 : index
    %c0_37 = arith.constant 0 : index
    %c0_38 = arith.constant 0 : index
    %91 = vector.load %arg3[%c2_36, %c0_37, %c0_38] : memref<3x8x128xf32, #tpu.memory_space<vmem>>, vector<1x8x128xf32>
    %92 = vector.shape_cast %91 : vector<1x8x128xf32> to vector<8x128xf32>
    %93 = vector.extract_strided_slice %92 {offsets = [0, 0], sizes = [1, 128], strides = [1, 1]} : vector<8x128xf32> to vector<1x128xf32>
    %94 = arith.truncf %93 : vector<1x128xf32> to vector<1x128xbf16>
    %95 = vector.extract_strided_slice %92 {offsets = [1, 0], sizes = [1, 128], strides = [1, 1]} : vector<8x128xf32> to vector<1x128xf32>
    %96 = vector.extract_strided_slice %89 {offsets = [0, 8], sizes = [128, 1], strides = [1, 1]} : vector<128x128xf32> to vector<128x1xf32>
    %cst_39 = arith.constant dense<0.000000e+00> : vector<1x128xf32>
    %97 = tpu.matmul %94, %90, %cst_39 {dimension_numbers = #tpu.dot_dimension_numbers<[1], [1], [0], [0], [0, 0, 1, 0], [], []>} : vector<1x128xbf16>, vector<128x128xbf16>, vector<1x128xf32> -> vector<1x128xf32>
    %98 = vector.broadcast %96 : vector<128x1xf32> to vector<128x128xf32>
    %99 = vector.broadcast %97 : vector<1x128xf32> to vector<128x128xf32>
    %100 = arith.addf %98, %99 : vector<128x128xf32>
    %cst_40 = arith.constant 2.000000e-01 : f32
    %101 = vector.broadcast %cst_40 : f32 to vector<128x128xf32>
    %102 = arith.mulf %101, %100 : vector<128x128xf32>
    %103 = arith.maximumf %100, %102 : vector<128x128xf32>
    %c0_41 = arith.constant 0 : index
    %c0_42 = arith.constant 0 : index
    %104 = vector.load %arg0[%c0_41, %c0_42] : memref<128x128xbf16, #tpu.memory_space<vmem>>, vector<128x128xbf16>
    %105 = arith.extf %104 : vector<128x128xbf16> to vector<128x128xf32>
    %106 = arith.addf %103, %105 : vector<128x128xf32>
    %cst_43 = arith.constant dense<0xFF800000> : vector<128xf32>
    %107 = vector.multi_reduction <maximumf>, %106, %cst_43 [1] : vector<128x128xf32> to vector<128xf32>
    %108 = vector.shape_cast %107 : vector<128xf32> to vector<128x1xf32>
    %109 = vector.broadcast %108 : vector<128x1xf32> to vector<128x128xf32>
    %110 = arith.subf %106, %109 : vector<128x128xf32>
    %111 = math.exp %110 : vector<128x128xf32>
    %cst_44 = arith.constant dense<0.000000e+00> : vector<128xf32>
    %112 = vector.multi_reduction <add>, %111, %cst_44 [1] : vector<128x128xf32> to vector<128xf32>
    %113 = vector.shape_cast %112 : vector<128xf32> to vector<128x1xf32>
    %114 = tpu.reciprocal %113 {approx = true} : vector<128x1xf32> -> vector<128x1xf32>
    %115 = arith.truncf %111 : vector<128x128xf32> to vector<128x128xbf16>
    %cst_45 = arith.constant dense<0.000000e+00> : vector<128x128xf32>
    %116 = tpu.matmul %115, %90, %cst_45 {dimension_numbers = #tpu.dot_dimension_numbers<[1], [0], [0], [1], [0, 0, 1, 1], [], []>} : vector<128x128xbf16>, vector<128x128xbf16>, vector<128x128xf32> -> vector<128x128xf32>
    %117 = vector.broadcast %114 : vector<128x1xf32> to vector<128x128xf32>
    %118 = arith.mulf %116, %117 : vector<128x128xf32>
    %119 = vector.broadcast %95 : vector<1x128xf32> to vector<128x128xf32>
    %120 = arith.addf %118, %119 : vector<128x128xf32>
    %121 = arith.truncf %120 : vector<128x128xf32> to vector<128x128xbf16>
    %c0_46 = arith.constant 0 : index
    %c0_47 = arith.constant 0 : index
    %122 = vector.load %arg4[%c0_46, %c0_47] : memref<128x128xbf16, #tpu.memory_space<vmem>>, vector<128x128xbf16>
    tpu.vector_store %arg4[%c0_46, %c0_47], %121 {strides = array<i32>} : memref<128x128xbf16, #tpu.memory_space<vmem>>, vector<128x128xbf16>,
    return
  }
}

</mosaic_0001>

<bundles_post_ra>
// kernel: tpu_custom_call.1
= control target key start
LH: loop header
LB: loop body
LE: loop exit
PB: predicated region body
PF: predicated region fallthrough
CT: control target
= control target key end

     0   :  { %9 = vsyncpa [#allocation3], 0  ;;  %s3999_s0 = inlined_call_operand.hbm [shape: bf16[128,128], index: 0, kind: input, shape index: {}]   ;;  %s4000_s1 = inlined_call_operand.hbm [shape: bf16[128,128], index: 1, kind: input, shape index: {}]   ;;  %s4001_s2 = inlined_call_operand.hbm [shape: bf16[3,128,128], index: 2, kind: input, shape index: {}]   ;;  %s4002_s3 = inlined_call_operand.hbm [shape: f32[3,8,128], index: 3, kind: input, shape index: {}]   ;;  %s4003_s4 = inlined_call_operand.hbm [shape: bf16[128,128], index: 4, kind: output, shape index: {}]  }
   0x1   :  { %10 = vsyncpa [#allocation6], 0 }
   0x2   :  { %11 = vsyncpa [#allocation9], 0 }
   0x3   :  { %12 = vsyncpa [#allocation4], 0  ;;  %s3335_s15 = smov [#allocation5]   ;;  %s3336_s17 = smov [#allocation2]  }
   0x4   :  { %s30_s16 = sshll.u32 %s3335_s15, 4  ;;  %s18_s18 = sshll.u32 %s3336_s17, 4  ;;  %s31_s16 = int_to_ptr.vmem [resolvable:$true] %s30_s16  ;;  %s19_s18 = int_to_ptr.vmem [resolvable:$true] %s18_s18 }
   0x5   :  { %s3235_s19 = scalar_lea.vmem %s31_s16, 1024  ;;  %p3240_p1 = scmp.lt.s32.totalorder %s31_s16, %s31_s16 }
   0x6   :  { %p3236_p0 = scmp.ne.s32.totalorder %s31_s16, %s3235_s19  ;;  %p3241_p2 = scmp.lt.s32.totalorder %s3235_s19, %s3235_s19 }
   0x8   :  { %p3242_p3 = por %p3241_p2, %p3240_p1 }
   0xa   :  { %p3243_p4 = pnand %p3242_p3, %p3236_p0 }
   0xc   :  { %3246 = shalt.err (!%p3243_p4)
}
   0xd   :  { %s3337_s20 = smov 64   ;;  %s3338_s21 = smov 4  }
   0xe   :  { %36 = dma.hbm_to_vmem [thread:$0]  %s4000_s1, 1024, %s31_s16, [#allocation6], %s3337_s20, %s3337_s20, %s3338_s21  }
   0xf   :  { %s3255_s24 = scalar_lea.vmem %s19_s18, 1024  ;;  %p3260_p6 = scmp.lt.s32.totalorder %s19_s18, %s19_s18 }
  0x10   :  { %p3256_p5 = scmp.ne.s32.totalorder %s19_s18, %s3255_s24  ;;  %p3261_p7 = scmp.lt.s32.totalorder %s3255_s24, %s3255_s24 }
  0x12   :  { %p3262_p8 = por %p3261_p7, %p3260_p6 }
  0x14   :  { %p3263_p9 = pnand %p3262_p8, %p3256_p5 }
  0x16   :  { %3266 = shalt.err (!%p3263_p9)
}
  0x17   :  { %24 = dma.hbm_to_vmem [thread:$0]  %s3999_s0, 1024, %s19_s18, [#allocation3], %s3337_s20, %s3337_s20, %s3338_s21  }
  0x18   :  { %s3339_s27 = smov [#allocation7]   ;;  %s3340_s29 = smov [#allocation8]  }
  0x19   :  { %s42_s28 = sshll.u32 %s3339_s27, 4  ;;  %s54_s30 = sshll.u32 %s3340_s29, 4  ;;  %s43_s28 = int_to_ptr.vmem [resolvable:$true] %s42_s28  ;;  %s55_s30 = int_to_ptr.vmem [resolvable:$true] %s54_s30 }
  0x1a   :  { %s3275_s1 = scalar_lea.vmem %s43_s28, 3072  ;;  %p3280_p11 = scmp.lt.s32.totalorder %s43_s28, %s43_s28 }
  0x1b   :  { %p3276_p10 = scmp.ne.s32.totalorder %s43_s28, %s3275_s1  ;;  %p3281_p12 = scmp.lt.s32.totalorder %s3275_s1, %s3275_s1 }
  0x1d   :  { %p3282_p13 = por %p3281_p12, %p3280_p11 }
  0x1f   :  { %p3283_p0 = pnand %p3282_p13, %p3276_p10 }
  0x21   :  { %3286 = shalt.err (!%p3283_p0)
}
  0x22   :  { %48 = dma.hbm_to_vmem [thread:$0]  %s4001_s2, 3072, %s43_s28, [#allocation6], %s3337_s20, %s3337_s20, %s3338_s21  }
  0x23   :  { %s3295_s0 = scalar_lea.vmem %s55_s30, 384  ;;  %p3300_p2 = scmp.lt.s32.totalorder %s55_s30, %s55_s30 }
  0x24   :  { %p3296_p1 = scmp.ne.s32.totalorder %s55_s30, %s3295_s0  ;;  %p3301_p3 = scmp.lt.s32.totalorder %s3295_s0, %s3295_s0 }
  0x26   :  { %p3302_p4 = por %p3301_p3, %p3300_p2 }
  0x28   :  { %p3303_p5 = pnand %p3302_p4, %p3296_p1 }
  0x2a   :  { %3306 = shalt.err (!%p3303_p5)
}
  0x2b   :  { %s3341_s7 = smov 128   ;;  %s3342_s8 = smov 8  }
  0x2c   :  { %60 = dma.hbm_to_vmem [thread:$0]  %s4002_s3, 384, %s55_s30, [#allocation9], %s3341_s7, %s3341_s7, %s3342_s8  }
  0x2d   :  { %3327 = dma.done.wait [#allocation3], 1024  }
  0x2e   :  { %3328 = vsyncadd [#allocation3], 4294966272 }
  0x2f   :  { %3329 = dma.done.wait [#allocation6], 4096  }
  0x30   :  { %3330 = vsyncadd [#allocation6], 4294963200 }
  0x31   :  { %3331 = dma.done.wait [#allocation9], 384  }
  0x32   :  { %3332 = vsyncadd [#allocation9], 4294966912  ;;  %v3343_v0 = vmov 32   ;;  %v2939_v1 = vld [vmem:[#allocation7 + $0x38] sm:$0xff]   ;;  %v2940_v2 = vld [vmem:[#allocation7 + $0x30] sm:$0xff]   ;;  %v3344_v17 = vmov 0.0   ;;  %v429_v47 = vlaneseq }
  0x33   :  { %2936 = vset.pattern.permute.xlu1 %v3343_v0  ;;  %2935 = vset.pattern.permute.xlu0 %v3343_v0  ;;  %v2941_v3 = vld [vmem:[#allocation7 + $0x28] sm:$0xff]   ;;  %v2942_v4 = vld [vmem:[#allocation7 + $0x20] sm:$0xff]   ;;  %v2943_v6 = vld [vmem:[#allocation7 + $0x18] sm:$0xff]   ;;  %vm3345_vm0 = vmmov 0   ;;  %s3347_s2 = smov [#allocation10]  }
  0x34   :  { %2670 = vmatprep.subr.bf16.mxu0 %v2939_v1  ;;  %v2947_v5 = vld [vmem:[#allocation5] sm:$0xff]   ;;  %v2944_v7 = vld [vmem:[#allocation7 + $0x10] sm:$0xff]   ;;  %v2945_v8 = vld [vmem:[#allocation7 + $0x8] sm:$0xff]   ;;  %2702 = vmatprep.subr.bf16.mxu1 %v3344_v17  ;;  %v3411_v49 = vshrl.u32 %v429_v47, 7  ;;  %s2351_s3 = sshll.u32 %s3347_s2, 4  ;;  %s2352_s3 = int_to_ptr.vmem [resolvable:$true] %s2351_s3 }
  0x35   :  { %2671 = vmatpush3.bf16.msra.mxu0 %v2939_v1  ;;  %2686 = vmatprep.mubr.bf16.mxu0 %v2947_v5  ;;  %v2946_v9 = vld [vmem:[#allocation7] sm:$0xff]   ;;  %v2948_v10 = vld [vmem:[#allocation5 + $0x8] sm:$0xff]   ;;  %v2949_v11 = vld [vmem:[#allocation5 + $0x10] sm:$0xff]   ;;  %s3307_s11 = scalar_lea.vmem %s2352_s3, 1024  ;;  %p3312_p7 = scmp.lt.s32.totalorder %s2352_s3, %s2352_s3 }
  0x36   :  { %2672 = vmatprep.subr.bf16.mxu0 %v2940_v2  ;;  %v2950_v12 = vld [vmem:[#allocation5 + $0x18] sm:$0xff]   ;;  %v2951_v13 = vld [vmem:[#allocation5 + $0x20] sm:$0xff]   ;;  %v2952_v14 = vld [vmem:[#allocation5 + $0x28] sm:$0xff]   ;;  %2718 = vmatprep.mubr.msk.bf16.mxu1 %vm3345_vm0, %v3344_v17  ;;  %v3414_v53 = vsub.s32 0, %v3411_v49  ;;  %p3308_p6 = scmp.ne.s32.totalorder %s2352_s3, %s3307_s11  ;;  %p3313_p8 = scmp.lt.s32.totalorder %s3307_s11, %s3307_s11 }
  0x37   :  { %v2953_v15 = vld [vmem:[#allocation5 + $0x30] sm:$0xff]   ;;  %v2954_v16 = vld [vmem:[#allocation5 + $0x38] sm:$0xff]   ;;  %v3404_v42 = vld [vmem:[#allocation8] sm:$0xff] }
  0x38   :  { %v308_v43 = vpack.c.bf16 %v3404_v42, %v3404_v42  ;;  %v2462_v57 = vld [vmem:[#allocation2] sm:$0xff]   ;;  %p3314_p9 = por %p3313_p8, %p3312_p7 }
  0x39   :  { %2673 = vmatpush3.bf16.msra.mxu0 %v2940_v2  ;;  %v3423_v1 = vunpack.c.h.bf16 %v2462_v57  ;;  %v2534_v2 = vld [vmem:[#allocation2 + $0x10] sm:$0xff]  }
  0x3a   :  { %2674 = vmatprep.subr.bf16.mxu0 %v2941_v3  ;;  %p3315_p10 = pnand %p3314_p9, %p3308_p6 }
  0x3d   :  { %2675 = vmatpush3.bf16.msra.mxu0 %v2941_v3  ;;  %v2533_v3 = vld [vmem:[#allocation2 + $0x8] sm:$0xff]  }
  0x3e   :  { %2676 = vmatprep.subr.bf16.mxu0 %v2942_v4 }
  0x41   :  { %2677 = vmatpush3.bf16.msra.mxu0 %v2942_v4 }
  0x42   :  { %2678 = vmatprep.subr.bf16.mxu0 %v2943_v6 }
  0x45   :  { %2679 = vmatpush3.bf16.msra.mxu0 %v2943_v6 }
  0x46   :  { %2680 = vmatprep.subr.bf16.mxu0 %v2944_v7 }
  0x49   :  { %2681 = vmatpush3.bf16.msra.mxu0 %v2944_v7 }
  0x4a   :  { %2682 = vmatprep.subr.bf16.mxu0 %v2945_v8 }
  0x4d   :  { %2683 = vmatpush3.bf16.msra.mxu0 %v2945_v8  ;;  %v3427_v8 = vunpack.c.l.bf16 %v2462_v57 }
  0x4e   :  { %2684 = vmatprep.subr.bf16.mxu0 %v2946_v9 }
  0x51   :  { %2685 = vmatpush3.bf16.msra.mxu0 %v2946_v9 }
  0x54   :  { %2687 = vmatmul.mubr.bf16.vlgmr.msra.gmra.mxu0 %v2948_v10 }
  0x55   :  { %2690 = vmatprep.mubr.bf16.mxu0 %v2949_v11 }
  0x5c   :  { %2691 = vmatmul.mubr.bf16.gmra.mxu0 %v2950_v12 }
  0x5d   :  { %2694 = vmatprep.mubr.bf16.mxu0 %v2951_v13 }
  0x64   :  { %2695 = vmatmul.mubr.bf16.gmra.mxu0 %v2952_v14 }
  0x65   :  { %2698 = vmatprep.mubr.bf16.mxu0 %v2953_v15  ;;  %v3429_v15 = vunpack.c.l.bf16 %v2534_v2 }
  0x6c   :  { %2699 = vmatmul.mubr.bf16.gmra.mxu0 %v2954_v16  ;;  %v3431_v16 = vunpack.c.l.bf16 %v2533_v3 }
 0x114   :  { %v2688_v18 = vpop.f32.mrf.mxu0 }
 0x115   :  { %361 = vperm.xlu1 %2936, %v2688_v18  }
 0x116   :  { %v236_v19 = vpop.f32.mrf.mxu0 }
 0x117   :  { %351 = vperm.xlu0 %2935, %v236_v19  }
 0x118   :  { %v2689_v20 = vpop.f32.mrf.mxu0 }
 0x119   :  { %366 = vperm.xlu1 %2936, %v2689_v20   ;;  %v300_v40 = vpack.c.bf16 %v2689_v20, %v2688_v18 }
 0x11a   :  { %v239_v21 = vpop.f32.mrf.mxu0 }
 0x11b   :  { %356 = vperm.xlu0 %2935, %v239_v21   ;;  %v299_v41 = vpack.c.bf16 %v239_v21, %v236_v19  ;;  %v2535_v19 = vld [vmem:[#allocation2 + $0x18] sm:$0xff]  }
 0x11c   :  { %v2692_v22 = vpop.f32.mrf.mxu0 }
 0x11e   :  { %v252_v23 = vpop.f32.mrf.mxu0 }
 0x11f   :  { %371 = vperm.xlu0 %2935, %v252_v23  }
 0x120   :  { %v2693_v24 = vpop.f32.mrf.mxu0 }
 0x121   :  { %v302_v38 = vpack.c.bf16 %v2693_v24, %v2692_v22 }
 0x122   :  { %v255_v25 = vpop.f32.mrf.mxu0 }
 0x123   :  { %381 = vperm.xlu0 %2935, %v2692_v22   ;;  %376 = vperm.xlu1 %2936, %v255_v25   ;;  %v301_v39 = vpack.c.bf16 %v255_v25, %v252_v23 }
 0x124   :  { %v2696_v26 = vpop.f32.mrf.mxu0 }
 0x126   :  { %v268_v27 = vpop.f32.mrf.mxu0 }
 0x127   :  { %386 = vperm.xlu1 %2936, %v2693_v24   ;;  %391 = vperm.xlu0 %2935, %v268_v27  }
 0x128   :  { %v2697_v28 = vpop.f32.mrf.mxu0 }
 0x129   :  { %v304_v36 = vpack.c.bf16 %v2697_v28, %v2696_v26 }
 0x12a   :  { %v271_v29 = vpop.f32.mrf.mxu0 }
 0x12b   :  { %401 = vperm.xlu0 %2935, %v2696_v26   ;;  %396 = vperm.xlu1 %2936, %v271_v29   ;;  %v303_v37 = vpack.c.bf16 %v271_v29, %v268_v27  ;;  %v3445_v29 = vunpack.c.h.bf16 %v2533_v3 }
 0x12c   :  { %v2700_v30 = vpop.f32.mrf.mxu0 }
 0x12e   :  { %v284_v31 = vpop.f32.mrf.mxu0 }
 0x12f   :  { %406 = vperm.xlu1 %2936, %v2697_v28   ;;  %411 = vperm.xlu0 %2935, %v284_v31   ;;  %v3443_v28 = vunpack.c.l.bf16 %v2535_v19 }
 0x130   :  { %v2701_v32 = vpop.f32.mrf.mxu0 }
 0x131   :  { %v306_v33 = vpack.c.bf16 %v2701_v32, %v2700_v30 }
 0x132   :  { %v287_v34 = vpop.f32.mrf.mxu0 }
 0x133   :  { %v305_v35 = vpack.c.bf16 %v287_v34, %v284_v31  ;;  %421 = vperm.xlu0 %2935, %v2700_v30   ;;  %2703 = vmatpush3.bf16.xpose.msra.mxu1 %v306_v33 }
 0x134   :  { %2722 = vmatprep.subr.bf16.mxu0 %v306_v33  ;;  %416 = vperm.xlu1 %2936, %v287_v34  }
 0x135   :  { %2723 = vmatpush3.bf16.msra.mxu0 %v306_v33  ;;  %2704 = vmatprep.subr.bf16.mxu1 %v3344_v17  ;;  %v2536_v33 = vld [vmem:[#allocation2 + $0x20] sm:$0xff]  }
 0x136   :  { %2724 = vmatprep.subr.bf16.mxu0 %v305_v35 }
 0x138   :  { %426 = vperm.xlu1 %2936, %v2701_v32  }
 0x139   :  { %2725 = vmatpush3.bf16.msra.mxu0 %v305_v35 }
 0x13a   :  { %2726 = vmatprep.subr.bf16.mxu0 %v304_v36 }
 0x13b   :  { %2705 = vmatpush3.bf16.xpose.msra.mxu1 %v305_v35 }
 0x13c   :  { %2706 = vmatprep.subr.bf16.mxu1 %v3344_v17 }
 0x13d   :  { %2727 = vmatpush3.bf16.msra.mxu0 %v304_v36 }
 0x13e   :  { %2728 = vmatprep.subr.bf16.mxu0 %v303_v37 }
 0x141   :  { %2729 = vmatpush3.bf16.msra.mxu0 %v303_v37 }
 0x142   :  { %2730 = vmatprep.subr.bf16.mxu0 %v302_v38 }
 0x143   :  { %2707 = vmatpush3.bf16.xpose.msra.mxu1 %v304_v36 }
 0x144   :  { %2708 = vmatprep.subr.bf16.mxu1 %v3344_v17 }
 0x145   :  { %2731 = vmatpush3.bf16.msra.mxu0 %v302_v38 }
 0x146   :  { %2732 = vmatprep.subr.bf16.mxu0 %v301_v39 }
 0x149   :  { %2733 = vmatpush3.bf16.msra.mxu0 %v301_v39 }
 0x14a   :  { %2734 = vmatprep.subr.bf16.mxu0 %v300_v40 }
 0x14b   :  { %2709 = vmatpush3.bf16.xpose.msra.mxu1 %v303_v37 }
 0x14c   :  { %2710 = vmatprep.subr.bf16.mxu1 %v3344_v17 }
 0x14d   :  { %2735 = vmatpush3.bf16.msra.mxu0 %v300_v40 }
 0x14e   :  { %2736 = vmatprep.subr.bf16.mxu0 %v299_v41 }
 0x151   :  { %2737 = vmatpush3.bf16.msra.mxu0 %v299_v41 }
 0x153   :  { %2711 = vmatpush3.bf16.xpose.msra.mxu1 %v302_v38 }
 0x154   :  { %2712 = vmatprep.subr.bf16.mxu1 %v3344_v17 }
 0x15b   :  { %2713 = vmatpush3.bf16.xpose.msra.mxu1 %v301_v39 }
 0x15c   :  { %2714 = vmatprep.subr.bf16.mxu1 %v3344_v17 }
 0x163   :  { %2715 = vmatpush3.bf16.xpose.msra.mxu1 %v300_v40 }
 0x164   :  { %2716 = vmatprep.subr.bf16.mxu1 %v3344_v17 }
 0x16b   :  { %2717 = vmatpush3.bf16.xpose.msra.mxu1 %v299_v41  ;;  %v3457_v41 = vunpack.c.l.bf16 %v2536_v33 }
 0x16c   :  { %2786 = vmatprep.subr.bf16.mxu1 %v3344_v17 }
 0x172   :  { %2719 = vmatmul.mubr.bf16.vlgmr.msra.gmra.mxu1 %v308_v43  ;;  %v3459_v43 = vunpack.c.h.bf16 %v2534_v2 }
 0x173   :  { %2802 = vmatprep.mubr.msk.bf16.mxu1 %vm3345_vm0, %v3344_v17 }
 0x190   :  { %v362_v46 = vpop.permute.xlu1 %361 }
 0x192   :  { %v352_v44 = vpop.permute.xlu0 %351 }
 0x194   :  { %v367_v50 = vpop.permute.xlu1 %366 }
 0x196   :  { %v357_v45 = vpop.permute.xlu0 %356 }
 0x19a   :  { %v372_v48 = vpop.permute.xlu0 %371 }
 0x19e   :  { %v382_v51 = vpop.permute.xlu0 %381  ;;  %v377_v52 = vpop.permute.xlu1 %376 }
 0x1a2   :  { %v392_v55 = vpop.permute.xlu0 %391  ;;  %v387_v59 = vpop.permute.xlu1 %386 }
 0x1a6   :  { %v402_v12 = vpop.permute.xlu0 %401  ;;  %v397_v23 = vpop.permute.xlu1 %396 }
 0x1aa   :  { %v412_v35 = vpop.permute.xlu0 %411  ;;  %v407_v40 = vpop.permute.xlu1 %406 }
 0x232   :  { %v343_v54 = vpop.f32.mrf.mxu1 }
 0x233   :  { %v3417_v56 = vrot.slane %v343_v54, %v3414_v53 }
 0x234   :  { %v2720_v58 = vpop.f32.mrf.mxu1 }
 0x235   :  { %v434_v60 = vadd.f32 %v3417_v56, %v357_v45  ;;  %v433_v61 = vadd.f32 %v3417_v56, %v352_v44  ;;  %v437_v62 = vadd.f32 %v3417_v56, %v372_v48  ;;  %v435_v63 = vadd.f32 %v3417_v56, %v362_v46  ;;  %v2537_v48 = vld [vmem:[#allocation2 + $0x28] sm:$0xff]  }
 0x236   :  { %v346_v0 = vpop.f32.mrf.mxu1  ;;  %v439_v4 = vadd.f32 %v3417_v56, %v382_v51  ;;  %v436_v5 = vadd.f32 %v3417_v56, %v367_v50  ;;  %v441_v21 = vadd.f32 %v3417_v56, %v392_v55  ;;  %v438_v22 = vadd.f32 %v3417_v56, %v377_v52  ;;  %v422_v55 = vpop.permute.xlu0 %421 }
 0x237   :  { %v450_v6 = vmul.f32 0.2, %v434_v60  ;;  %v449_v7 = vmul.f32 0.2, %v433_v61  ;;  %v453_v9 = vmul.f32 0.2, %v437_v62  ;;  %v443_v38 = vadd.f32 %v3417_v56, %v402_v12  ;;  %v417_v0 = vpop.permute.xlu1 %416 }
 0x238   :  { %v2721_v10 = vpop.f32.mrf.mxu1  ;;  %v451_v11 = vmul.f32 0.2, %v435_v63  ;;  %v455_v18 = vmul.f32 0.2, %v439_v4  ;;  %v452_v20 = vmul.f32 0.2, %v436_v5  ;;  %v440_v39 = vadd.f32 %v3417_v56, %v387_v59 }
 0x239   :  { %v466_v13 = vmax.f32 %v434_v60, %v450_v6  ;;  %v465_v14 = vmax.f32 %v433_v61, %v449_v7  ;;  %v469_v26 = vmax.f32 %v437_v62, %v453_v9  ;;  %v457_v32 = vmul.f32 0.2, %v441_v21  ;;  %v2538_v61 = vld [vmem:[#allocation2 + $0x30] sm:$0xff]  }
 0x23a   :  { %v467_v27 = vmax.f32 %v435_v63, %v451_v11  ;;  %v471_v30 = vmax.f32 %v439_v4, %v455_v18  ;;  %v468_v31 = vmax.f32 %v436_v5, %v452_v20  ;;  %v454_v34 = vmul.f32 0.2, %v438_v22 }
 0x23b   :  { %v3436_v24 = vadd.f32 %v3423_v1, %v466_v13  ;;  %v3439_v25 = vadd.f32 %v3427_v8, %v465_v14  ;;  %v3448_v36 = vadd.f32 %v3429_v15, %v469_v26  ;;  %v473_v46 = vmax.f32 %v441_v21, %v457_v32  ;;  %v427_v20 = vpop.permute.xlu1 %426 }
 0x23c   :  { %v3451_v37 = vadd.f32 %v3431_v16, %v467_v27  ;;  %v3462_v44 = vadd.f32 %v3443_v28, %v471_v30  ;;  %v3465_v45 = vadd.f32 %v3445_v29, %v468_v31  ;;  %v470_v47 = vmax.f32 %v438_v22, %v454_v34 }
 0x23d   :  { %531 = vmax.xlane.f32.xlu1 %v3436_v24  ;;  %529 = vmax.xlane.f32.xlu0 %v3439_v25  ;;  %v459_v50 = vmul.f32 0.2, %v443_v38  ;;  %v456_v51 = vmul.f32 0.2, %v440_v39  ;;  %v445_v52 = vadd.f32 %v3417_v56, %v412_v35  ;;  %v442_v54 = vadd.f32 %v3417_v56, %v397_v23 }
 0x23e   :  { %v3471_v57 = vunpack.c.l.bf16 %v2537_v48  ;;  %v3473_v58 = vunpack.c.h.bf16 %v2535_v19  ;;  %v3476_v59 = vadd.f32 %v3457_v41, %v473_v46  ;;  %v3479_v60 = vadd.f32 %v3459_v43, %v470_v47  ;;  %v2539_v19 = vld [vmem:[#allocation2 + $0x38] sm:$0xff]  }
 0x23f   :  { %v447_v62 = vadd.f32 %v3417_v56, %v422_v55  ;;  %v444_v63 = vadd.f32 %v3417_v56, %v407_v40  ;;  %v475_v2 = vmax.f32 %v443_v38, %v459_v50  ;;  %v472_v3 = vmax.f32 %v440_v39, %v456_v51 }
 0x240   :  { %v461_v4 = vmul.f32 0.2, %v445_v52  ;;  %v458_v5 = vmul.f32 0.2, %v442_v54  ;;  %v3485_v6 = vunpack.c.l.bf16 %v2538_v61  ;;  %v3487_v7 = vunpack.c.h.bf16 %v2536_v33 }
 0x241   :  { %537 = vmax.xlane.f32.xlu1 %v3448_v36  ;;  %533 = vmax.xlane.f32.xlu0 %v3451_v37  ;;  %v463_v9 = vmul.f32 0.2, %v447_v62  ;;  %v460_v10 = vmul.f32 0.2, %v444_v63  ;;  %v446_v11 = vadd.f32 %v3417_v56, %v417_v0  ;;  %v3491_v12 = vadd.f32 %v3471_v57, %v475_v2 }
 0x242   :  { %v3494_v13 = vadd.f32 %v3473_v58, %v472_v3  ;;  %v477_v14 = vmax.f32 %v445_v52, %v461_v4  ;;  %v474_v18 = vmax.f32 %v442_v54, %v458_v5  ;;  %v3498_v21 = vunpack.c.l.bf16 %v2539_v19 }
 0x243   :  { %v3500_v22 = vunpack.c.h.bf16 %v2537_v48  ;;  %v462_v23 = vmul.f32 0.2, %v446_v11  ;;  %v448_v26 = vadd.f32 %v3417_v56, %v427_v20  ;;  %v479_v31 = vmax.f32 %v447_v62, %v463_v9 }
 0x244   :  { %v3504_v27 = vadd.f32 %v3485_v6, %v477_v14  ;;  %v3507_v30 = vadd.f32 %v3487_v7, %v474_v18  ;;  %v476_v32 = vmax.f32 %v444_v63, %v460_v10  ;;  %v3511_v33 = vunpack.c.h.bf16 %v2538_v61 }
 0x245   :  { %541 = vmax.xlane.f32.xlu1 %v3462_v44  ;;  %535 = vmax.xlane.f32.xlu0 %v3465_v45  ;;  %v3514_v34 = vadd.f32 %v3498_v21, %v479_v31  ;;  %v478_v56 = vmax.f32 %v446_v11, %v462_v23  ;;  %v464_v38 = vmul.f32 0.2, %v448_v26  ;;  %v3524_v46 = vunpack.c.h.bf16 %v2539_v19 }
 0x246   :  { %v3517_v35 = vadd.f32 %v3500_v22, %v476_v32 }
 0x247   :  { %v3522_v39 = vadd.f32 %v3511_v33, %v478_v56  ;;  %v480_v40 = vmax.f32 %v448_v26, %v464_v38 }
 0x249   :  { %545 = vmax.xlane.f32.xlu1 %v3476_v59  ;;  %539 = vmax.xlane.f32.xlu0 %v3479_v60  ;;  %v3528_v47 = vadd.f32 %v3524_v46, %v480_v40 }
 0x24d   :  { %549 = vmax.xlane.f32.xlu1 %v3491_v12  ;;  %543 = vmax.xlane.f32.xlu0 %v3494_v13 }
 0x251   :  { %553 = vmax.xlane.f32.xlu1 %v3504_v27  ;;  %547 = vmax.xlane.f32.xlu0 %v3507_v30 }
 0x255   :  { %557 = vmax.xlane.f32.xlu1 %v3514_v34  ;;  %551 = vmax.xlane.f32.xlu0 %v3517_v35 }
 0x259   :  { %555 = vmax.xlane.f32.xlu0 %v3522_v39 }
 0x25d   :  { %559 = vmax.xlane.f32.xlu0 %v3528_v47 }
 0x2c6   :  { %v532_v48 = vpop.xlane.xlu1 %531  ;;  %v530_v50 = vpop.xlane.xlu0 %529 }
 0x2c7   :  { %v562_v51 = vsub.f32 %v3436_v24, %v532_v48  ;;  %v561_v52 = vsub.f32 %v3439_v25, %v530_v50 }
 0x2c9   :  { %v579_v54 = vmul.f32 1.442695, %v562_v51  ;;  %v577_v55 = vmul.f32 1.442695, %v561_v52 }
 0x2ca   :  { %v538_v61 = vpop.xlane.xlu1 %537  ;;  %v534_v62 = vpop.xlane.xlu0 %533 }
 0x2cb   :  { %2971 = vpow2.f32 %v579_v54  ;;  %v565_v63 = vsub.f32 %v3448_v36, %v538_v61  ;;  %v563_v0 = vsub.f32 %v3451_v37, %v534_v62 }
 0x2cc   :  { %2973 = vpow2.f32 %v577_v55 }
 0x2cd   :  { %v581_v2 = vmul.f32 1.442695, %v563_v0  ;;  %v585_v5 = vmul.f32 1.442695, %v565_v63 }
 0x2ce   :  { %v542_v3 = vpop.xlane.xlu1 %541  ;;  %v536_v4 = vpop.xlane.xlu0 %535 }
 0x2cf   :  { %v567_v9 = vsub.f32 %v3462_v44, %v542_v3  ;;  %v564_v24 = vsub.f32 %v3465_v45, %v536_v4  ;;  %2975 = vpow2.f32 %v581_v2 }
 0x2d0   :  { %2977 = vpow2.f32 %v585_v5 }
 0x2d1   :  { %v583_v25 = vmul.f32 1.442695, %v564_v24  ;;  %v589_v14 = vmul.f32 1.442695, %v567_v9 }
 0x2d2   :  { %v546_v10 = vpop.xlane.xlu1 %545  ;;  %v540_v11 = vpop.xlane.xlu0 %539 }
 0x2d3   :  { %v569_v18 = vsub.f32 %v3476_v59, %v546_v10  ;;  %v566_v36 = vsub.f32 %v3479_v60, %v540_v11  ;;  %2979 = vpow2.f32 %v583_v25 }
 0x2d4   :  { %2981 = vpow2.f32 %v589_v14 }
 0x2d5   :  { %v587_v37 = vmul.f32 1.442695, %v566_v36  ;;  %v593_v23 = vmul.f32 1.442695, %v569_v18 }
 0x2d6   :  { %v550_v19 = vpop.xlane.xlu1 %549  ;;  %v544_v20 = vpop.xlane.xlu0 %543 }
 0x2d7   :  { %v571_v44 = vsub.f32 %v3491_v12, %v550_v19  ;;  %v568_v45 = vsub.f32 %v3494_v13, %v544_v20  ;;  %2983 = vpow2.f32 %v587_v37 }
 0x2d8   :  { %v2972_v26 = vpop.eup %2971  ;;  %2985 = vpow2.f32 %v593_v23 }
 0x2d9   :  { %v2974_v31 = vpop.eup %2973  ;;  %v591_v32 = vmul.f32 1.442695, %v568_v45  ;;  %611 = vadd.xlane.f32.xlu0 %v2972_v26  ;;  %v597_v60 = vmul.f32 1.442695, %v571_v44 }
 0x2da   :  { %609 = vadd.xlane.f32.xlu1 %v2974_v31  ;;  %v554_v56 = vpop.xlane.xlu1 %553  ;;  %v548_v59 = vpop.xlane.xlu0 %547  ;;  %v657_v38 = vpack.c.bf16 %v2972_v26, %v2974_v31  ;;  %v2955_v26 = vld [vmem:[#allocation7 + $0x78] sm:$0xff]   ;;  %v2956_v31 = vld [vmem:[#allocation7 + $0x70] sm:$0xff]  }
 0x2db   :  { %v573_v40 = vsub.f32 %v3504_v27, %v554_v56  ;;  %v570_v48 = vsub.f32 %v3507_v30, %v548_v59  ;;  %2987 = vpow2.f32 %v591_v32  ;;  %2754 = vmatprep.subr.bf16.mxu0 %v2955_v26  ;;  %v2957_v32 = vld [vmem:[#allocation7 + $0x68] sm:$0xff]   ;;  %v2958_v56 = vld [vmem:[#allocation7 + $0x60] sm:$0xff]   ;;  %v2959_v59 = vld [vmem:[#allocation7 + $0x58] sm:$0xff]  }
 0x2dc   :  { %2738 = vmatprep.mubr.bf16.mxu0 %v657_v38  ;;  %v2976_v12 = vpop.eup %2975  ;;  %2989 = vpow2.f32 %v597_v60  ;;  %v2960_v38 = vld [vmem:[#allocation7 + $0x50] sm:$0xff]   ;;  %v2961_v60 = vld [vmem:[#allocation7 + $0x48] sm:$0xff]  }
 0x2dd   :  { %v595_v50 = vmul.f32 1.442695, %v570_v48  ;;  %v601_v52 = vmul.f32 1.442695, %v573_v40  ;;  %v2978_v55 = vpop.eup %2977  ;;  %v2962_v40 = vld [vmem:[#allocation7 + $0x40] sm:$0xff]  }
 0x2de   :  { %613 = vadd.xlane.f32.xlu1 %v2976_v12  ;;  %v558_v13 = vpop.xlane.xlu1 %557  ;;  %v552_v51 = vpop.xlane.xlu0 %551 }
 0x2df   :  { %v572_v54 = vsub.f32 %v3517_v35, %v552_v51  ;;  %2991 = vpow2.f32 %v595_v50  ;;  %v575_v61 = vsub.f32 %v3514_v34, %v558_v13 }
 0x2e0   :  { %v2980_v62 = vpop.eup %2979  ;;  %2993 = vpow2.f32 %v601_v52 }
 0x2e1   :  { %v599_v63 = vmul.f32 1.442695, %v572_v54  ;;  %615 = vadd.xlane.f32.xlu0 %v2980_v62  ;;  %v658_v30 = vpack.c.bf16 %v2980_v62, %v2976_v12  ;;  %v2982_v2 = vpop.eup %2981  ;;  %v605_v3 = vmul.f32 1.442695, %v575_v61 }
 0x2e2   :  { %617 = vadd.xlane.f32.xlu1 %v2978_v55  ;;  %v556_v27 = vpop.xlane.xlu0 %555 }
 0x2e3   :  { %v574_v0 = vsub.f32 %v3522_v39, %v556_v27  ;;  %2995 = vpow2.f32 %v599_v63  ;;  %2739 = vmatmul.mubr.bf16.vlgmr.msra.gmra.mxu0 %v658_v30  ;;  %v3548_v63 = vsub.s32 1, %v3411_v49 }
 0x2e4   :  { %v2984_v4 = vpop.eup %2983  ;;  %2755 = vmatpush3.bf16.msra.mxu0 %v2955_v26 }
 0x2e5   :  { %v603_v5 = vmul.f32 1.442695, %v574_v0  ;;  %619 = vadd.xlane.f32.xlu0 %v2984_v4  ;;  %v659_v9 = vpack.c.bf16 %v2984_v4, %v2978_v55  ;;  %v2986_v24 = vpop.eup %2985  ;;  %2756 = vmatprep.subr.bf16.mxu0 %v2956_v31  ;;  %v3552_v30 = vrot.slane %v3404_v42, %v3548_v63 }
 0x2e6   :  { %621 = vadd.xlane.f32.xlu1 %v2982_v2  ;;  %v560_v35 = vpop.xlane.xlu0 %559 }
 0x2e7   :  { %2997 = vpow2.f32 %v603_v5  ;;  %v576_v34 = vsub.f32 %v3528_v47, %v560_v35  ;;  %2742 = vmatprep.mubr.bf16.mxu0 %v659_v9 }
 0x2e8   :  { %2999 = vpow2.f32 %v605_v3  ;;  %v2988_v25 = vpop.eup %2987  ;;  %2757 = vmatpush3.bf16.msra.mxu0 %v2956_v31 }
 0x2e9   :  { %v607_v10 = vmul.f32 1.442695, %v576_v34  ;;  %623 = vadd.xlane.f32.xlu0 %v2988_v25  ;;  %v660_v39 = vpack.c.bf16 %v2988_v25, %v2982_v2  ;;  %v2990_v11 = vpop.eup %2989  ;;  %2758 = vmatprep.subr.bf16.mxu0 %v2957_v32 }
 0x2ea   :  { %625 = vadd.xlane.f32.xlu1 %v2986_v24 }
 0x2eb   :  { %3001 = vpow2.f32 %v607_v10  ;;  %2743 = vmatmul.mubr.bf16.gmra.mxu0 %v660_v39 }
 0x2ec   :  { %v2992_v14 = vpop.eup %2991  ;;  %2759 = vmatpush3.bf16.msra.mxu0 %v2957_v32 }
 0x2ed   :  { %627 = vadd.xlane.f32.xlu0 %v2992_v14  ;;  %v661_v18 = vpack.c.bf16 %v2992_v14, %v2986_v24  ;;  %v2994_v36 = vpop.eup %2993  ;;  %2760 = vmatprep.subr.bf16.mxu0 %v2958_v56 }
 0x2ee   :  { %629 = vadd.xlane.f32.xlu1 %v2990_v11 }
 0x2ef   :  { %2746 = vmatprep.mubr.bf16.mxu0 %v661_v18 }
 0x2f0   :  { %v2996_v37 = vpop.eup %2995  ;;  %2761 = vmatpush3.bf16.msra.mxu0 %v2958_v56 }
 0x2f1   :  { %631 = vadd.xlane.f32.xlu0 %v2996_v37  ;;  %v662_v47 = vpack.c.bf16 %v2996_v37, %v2990_v11  ;;  %2762 = vmatprep.subr.bf16.mxu0 %v2959_v59 }
 0x2f2   :  { %633 = vadd.xlane.f32.xlu1 %v2994_v36 }
 0x2f3   :  { %2747 = vmatmul.mubr.bf16.gmra.mxu0 %v662_v47 }
 0x2f4   :  { %v2998_v19 = vpop.eup %2997  ;;  %2763 = vmatpush3.bf16.msra.mxu0 %v2959_v59 }
 0x2f5   :  { %v3000_v20 = vpop.eup %2999  ;;  %v663_v23 = vpack.c.bf16 %v2998_v19, %v2994_v36  ;;  %635 = vadd.xlane.f32.xlu0 %v2998_v19  ;;  %2764 = vmatprep.subr.bf16.mxu0 %v2960_v38 }
 0x2f6   :  { %637 = vadd.xlane.f32.xlu1 %v3000_v20 }
 0x2f7   :  { %2750 = vmatprep.mubr.bf16.mxu0 %v663_v23 }
 0x2f8   :  { %v3002_v44 = vpop.eup %3001  ;;  %2765 = vmatpush3.bf16.msra.mxu0 %v2960_v38 }
 0x2f9   :  { %v664_v45 = vpack.c.bf16 %v3002_v44, %v3000_v20  ;;  %639 = vadd.xlane.f32.xlu0 %v3002_v44  ;;  %2766 = vmatprep.subr.bf16.mxu0 %v2961_v60 }
 0x2fb   :  { %2751 = vmatmul.mubr.bf16.gmra.mxu0 %v664_v45 }
 0x2fc   :  { %2767 = vmatpush3.bf16.msra.mxu0 %v2961_v60 }
 0x2fd   :  { %2768 = vmatprep.subr.bf16.mxu0 %v2962_v40 }
 0x300   :  { %2769 = vmatpush3.bf16.msra.mxu0 %v2962_v40 }
 0x362   :  { %v612_v12 = vpop.xlane.xlu0 %611 }
 0x363   :  { %v610_v48 = vpop.xlane.xlu1 %609 }
 0x367   :  { %v614_v50 = vpop.xlane.xlu1 %613 }
 0x368   :  { %3003 = vrcp.f32 %v614_v50 }
 0x369   :  { %3005 = vrcp.f32 %v610_v48 }
 0x36a   :  { %v616_v13 = vpop.xlane.xlu0 %615 }
 0x36b   :  { %v618_v51 = vpop.xlane.xlu1 %617  ;;  %3007 = vrcp.f32 %v616_v13 }
 0x36c   :  { %3009 = vrcp.f32 %v612_v12 }
 0x36e   :  { %v620_v52 = vpop.xlane.xlu0 %619 }
 0x36f   :  { %v622_v54 = vpop.xlane.xlu1 %621 }
 0x370   :  { %3011 = vrcp.f32 %v622_v54 }
 0x371   :  { %3013 = vrcp.f32 %v618_v51 }
 0x372   :  { %v624_v55 = vpop.xlane.xlu0 %623 }
 0x373   :  { %v626_v61 = vpop.xlane.xlu1 %625  ;;  %3015 = vrcp.f32 %v624_v55 }
 0x374   :  { %3017 = vrcp.f32 %v620_v52 }
 0x375   :  { %v3004_v0 = vpop.eup %3003 }
 0x376   :  { %v628_v62 = vpop.xlane.xlu0 %627  ;;  %v3006_v5 = vpop.eup %3005 }
 0x377   :  { %v630_v27 = vpop.xlane.xlu1 %629 }
 0x378   :  { %v3008_v24 = vpop.eup %3007  ;;  %3019 = vrcp.f32 %v630_v27 }
 0x379   :  { %3021 = vrcp.f32 %v626_v61  ;;  %v3010_v18 = vpop.eup %3009 }
 0x37a   :  { %v632_v2 = vpop.xlane.xlu0 %631 }
 0x37b   :  { %v634_v35 = vpop.xlane.xlu1 %633  ;;  %3023 = vrcp.f32 %v632_v2 }
 0x37c   :  { %3025 = vrcp.f32 %v628_v62 }
 0x37d   :  { %v3012_v23 = vpop.eup %3011  ;;  %3027 = vrcp.f32 %v634_v35 }
 0x37e   :  { %v636_v39 = vpop.xlane.xlu0 %635  ;;  %v3014_v26 = vpop.eup %3013 }
 0x37f   :  { %v638_v47 = vpop.xlane.xlu1 %637 }
 0x380   :  { %3029 = vrcp.f32 %v638_v47  ;;  %v3016_v40 = vpop.eup %3015 }
 0x381   :  { %v3018_v54 = vpop.eup %3017 }
 0x382   :  { %v640_v48 = vpop.xlane.xlu0 %639 }
 0x3a3   :  { %v2740_v3 = vpop.f32.mrf.mxu0 }
 0x3a4   :  { %v764_v4 = vmul.f32 %v3004_v0, %v2740_v3 }
 0x3a5   :  { %v699_v9 = vpop.f32.mrf.mxu0 }
 0x3a6   :  { %v3555_v34 = vadd.f32 %v3552_v30, %v764_v4  ;;  %v762_v49 = vmul.f32 %v3006_v5, %v699_v9  ;;  %v3020_v4 = vpop.eup %3019 }
 0x3a7   :  { %v2741_v25 = vpop.f32.mrf.mxu0 }
 0x3a8   :  { %v3558_v10 = vadd.f32 %v3552_v30, %v762_v49  ;;  %v765_v42 = vmul.f32 %v3008_v24, %v2741_v25  ;;  %v816_v11 = vmin.f32 %v3555_v34, 0.0  ;;  %vm800_vm1 = vcmp.gt.f32.partialorder %v3555_v34, 0.0 }
 0x3a9   :  { %v702_v14 = vpop.f32.mrf.mxu0 }
 0x3aa   :  { %v814_v36 = vmin.f32 %v3558_v10, 0.0  ;;  %v3563_v37 = vadd.f32 %v3552_v30, %v765_v42  ;;  %v763_v19 = vmul.f32 %v3010_v18, %v702_v14  ;;  %v834_v31 = vmul.f32 1.442695, %v816_v11  ;;  %v3022_v42 = vpop.eup %3021 }
 0x3ab   :  { %v2744_v20 = vpop.f32.mrf.mxu0  ;;  %v3024_v18 = vpop.eup %3023  ;;  %vm798_vm3 = vcmp.gt.f32.partialorder %v3558_v10, 0.0 }
 0x3ac   :  { %v830_v44 = vmul.f32 1.442695, %v814_v36  ;;  %v817_v45 = vmin.f32 %v3563_v37, 0.0  ;;  %v3567_v32 = vadd.f32 %v3552_v30, %v763_v19  ;;  %v768_v56 = vmul.f32 %v3012_v23, %v2744_v20  ;;  %v3026_v23 = vpop.eup %3025 }
 0x3ad   :  { %v715_v59 = vpop.f32.mrf.mxu0  ;;  %vm801_vm2 = vcmp.gt.f32.partialorder %v3563_v37, 0.0 }
 0x3ae   :  { %v836_v38 = vmul.f32 1.442695, %v817_v45  ;;  %v766_v60 = vmul.f32 %v3014_v26, %v715_v59  ;;  %3031 = vpow2.f32 %v830_v44  ;;  %v815_v12 = vmin.f32 %v3567_v32, 0.0 }
 0x3af   :  { %v3571_v50 = vadd.f32 %v3552_v30, %v768_v56  ;;  %v2745_v13 = vpop.f32.mrf.mxu0  ;;  %vm799_vm4 = vcmp.gt.f32.partialorder %v3567_v32, 0.0 }
 0x3b0   :  { %3033 = vpow2.f32 %v836_v38  ;;  %v3574_v51 = vadd.f32 %v3552_v30, %v766_v60  ;;  %v769_v52 = vmul.f32 %v3016_v40, %v2745_v13  ;;  %v832_v55 = vmul.f32 1.442695, %v815_v12 }
 0x3b1   :  { %3035 = vpow2.f32 %v834_v31  ;;  %v820_v61 = vmin.f32 %v3571_v50, 0.0  ;;  %v718_v62 = vpop.f32.mrf.mxu0  ;;  %v3028_v31 = vpop.eup %3027  ;;  %vm804_vm8 = vcmp.gt.f32.partialorder %v3571_v50, 0.0 }
 0x3b2   :  { %3037 = vrcp.f32 %v640_v48  ;;  %v818_v27 = vmin.f32 %v3574_v51, 0.0  ;;  %v3579_v0 = vadd.f32 %v3552_v30, %v769_v52  ;;  %v767_v2 = vmul.f32 %v3018_v54, %v718_v62  ;;  %v3030_v38 = vpop.eup %3029 }
 0x3b3   :  { %3039 = vpow2.f32 %v832_v55  ;;  %v2748_v3 = vpop.f32.mrf.mxu0  ;;  %v842_v49 = vmul.f32 1.442695, %v820_v61  ;;  %vm802_vm5 = vcmp.gt.f32.partialorder %v3574_v51, 0.0 }
 0x3b4   :  { %3041 = vrcp.f32 %v636_v39  ;;  %v838_v5 = vmul.f32 1.442695, %v818_v27  ;;  %v821_v35 = vmin.f32 %v3579_v0, 0.0  ;;  %v3583_v9 = vadd.f32 %v3552_v30, %v767_v2 }
 0x3b5   :  { %v772_v24 = vmul.f32 %v3020_v4, %v2748_v3  ;;  %v731_v25 = vpop.f32.mrf.mxu0  ;;  %vm805_vm7 = vcmp.gt.f32.partialorder %v3579_v0, 0.0 }
 0x3b6   :  { %3043 = vpow2.f32 %v838_v5  ;;  %v844_v11 = vmul.f32 1.442695, %v821_v35  ;;  %v819_v14 = vmin.f32 %v3583_v9, 0.0  ;;  %v770_v47 = vmul.f32 %v3022_v42, %v731_v25 }
 0x3b7   :  { %v3587_v36 = vadd.f32 %v3552_v30, %v772_v24  ;;  %v2749_v39 = vpop.f32.mrf.mxu0  ;;  %vm803_vm6 = vcmp.gt.f32.partialorder %v3583_v9, 0.0 }
 0x3b8   :  { %3045 = vpow2.f32 %v844_v11  ;;  %v840_v19 = vmul.f32 1.442695, %v819_v14  ;;  %v773_v20 = vmul.f32 %v3024_v18, %v2749_v39  ;;  %v3591_v45 = vadd.f32 %v3552_v30, %v770_v47 }
 0x3b9   :  { %3047 = vpow2.f32 %v842_v49  ;;  %v824_v44 = vmin.f32 %v3587_v36, 0.0  ;;  %v734_v26 = vpop.f32.mrf.mxu0  ;;  %vm808_vm12 = vcmp.gt.f32.partialorder %v3587_v36, 0.0 }
 0x3ba   :  { %3049 = vpow2.f32 %v840_v19  ;;  %v3594_v56 = vadd.f32 %v3552_v30, %v773_v20  ;;  %v771_v59 = vmul.f32 %v3026_v23, %v734_v26  ;;  %v822_v60 = vmin.f32 %v3591_v45, 0.0 }
 0x3bb   :  { %v2752_v40 = vpop.f32.mrf.mxu0  ;;  %v3032_v48 = vpop.eup %3031  ;;  %v850_v54 = vmul.f32 1.442695, %v824_v44  ;;  %vm806_vm9 = vcmp.gt.f32.partialorder %v3591_v45, 0.0 }
 0x3bc   :  { %v825_v12 = vmin.f32 %v3594_v56, 0.0  ;;  %v3599_v13 = vadd.f32 %v3552_v30, %v771_v59  ;;  %v846_v55 = vmul.f32 1.442695, %v822_v60  ;;  %v776_v61 = vmul.f32 %v3030_v38, %v2752_v40 }
 0x3bd   :  { %v3034_v52 = vpop.eup %3033  ;;  %v747_v62 = vpop.f32.mrf.mxu0  ;;  %v2381_v14 = vadd.f32 -1.0, %v3032_v48  ;;  %vm809_vm11 = vcmp.gt.f32.partialorder %v3594_v56, 0.0 }
 0x3be   :  { %v3036_v27 = vpop.eup %3035  ;;  %v852_v2 = vmul.f32 1.442695, %v825_v12  ;;  %v823_v3 = vmin.f32 %v3599_v13, 0.0  ;;  %v2384_v5 = vadd.f32 -1.0, %v3034_v52  ;;  %3051 = vpow2.f32 %v846_v55 }
 0x3bf   :  { %v3038_v4 = vpop.eup %3037  ;;  %v3605_v35 = vadd.f32 %v3552_v30, %v776_v61  ;;  %v774_v49 = vmul.f32 %v3028_v31, %v747_v62  ;;  %v2753_v24 = vpop.f32.mrf.mxu0  ;;  %v2383_v47 = vadd.f32 -1.0, %v3036_v27  ;;  %v878_v48 = vsel %vm798_vm3, %v3558_v10, %v2381_v14 }
 0x3c0   :  { %v3040_v25 = vpop.eup %3039  ;;  %3053 = vpow2.f32 %v852_v2  ;;  %v848_v42 = vmul.f32 1.442695, %v823_v3  ;;  %v777_v11 = vmul.f32 %v3038_v4, %v2753_v24  ;;  %v881_v59 = vsel %vm801_vm2, %v3563_v37, %v2384_v5 }
 0x3c1   :  { %v3042_v18 = vpop.eup %3041  ;;  %3055 = vpow2.f32 %v850_v54  ;;  %v828_v39 = vmin.f32 %v3605_v35, 0.0  ;;  %v3609_v19 = vadd.f32 %v3552_v30, %v774_v49  ;;  %v750_v20 = vpop.f32.mrf.mxu0  ;;  %v2382_v26 = vadd.f32 -1.0, %v3040_v25 }
 0x3c2   :  { %3057 = vpow2.f32 %v848_v42  ;;  %v3612_v23 = vadd.f32 %v3552_v30, %v777_v11  ;;  %v775_v44 = vmul.f32 %v3042_v18, %v750_v20  ;;  %v880_v54 = vsel %vm800_vm1, %v3555_v34, %v2383_v47 }
 0x3c3   :  { %v3044_v31 = vpop.eup %3043  ;;  %v826_v38 = vmin.f32 %v3609_v19, 0.0  ;;  %v879_v12 = vsel %vm799_vm4, %v3567_v32, %v2382_v26  ;;  %v858_v55 = vmul.f32 1.442695, %v828_v39  ;;  %v895_v27 = vpack.c.bf16 %v881_v59, %v880_v54 }
 0x3c4   :  { %v829_v60 = vmin.f32 %v3612_v23, 0.0  ;;  %v3622_v40 = vadd.f32 %v3552_v30, %v775_v44  ;;  %v894_v61 = vpack.c.bf16 %v879_v12, %v878_v48  ;;  %v2385_v4 = vadd.f32 -1.0, %v3044_v31 }
 0x3c5   :  { %v3046_v52 = vpop.eup %3045  ;;  %v854_v37 = vmul.f32 1.442695, %v826_v38  ;;  %vm807_vm10 = vcmp.gt.f32.partialorder %v3599_v13, 0.0  ;;  %vm810_vm13 = vcmp.gt.f32.partialorder %v3609_v19, 0.0  ;;  %vm813_vm15 = vcmp.gt.f32.partialorder %v3612_v23, 0.0 }
 0x3c6   :  { %v3048_v62 = vpop.eup %3047  ;;  %v860_v2 = vmul.f32 1.442695, %v829_v60  ;;  %v827_v3 = vmin.f32 %v3622_v40, 0.0  ;;  %2770 = vmatprep.mubr.bf16.mxu0 %v894_v61  ;;  %v2388_v10 = vadd.f32 -1.0, %v3046_v52  ;;  %v882_v49 = vsel %vm802_vm5, %v3574_v51, %v2385_v4 }
 0x3c7   :  { %v3050_v30 = vpop.eup %3049  ;;  %3059 = vpow2.f32 %v854_v37  ;;  %2771 = vmatmul.mubr.bf16.vlgmr.msra.gmra.mxu0 %v895_v27  ;;  %v2387_v34 = vadd.f32 -1.0, %v3048_v62  ;;  %vm811_vm14 = vcmp.gt.f32.partialorder %v3622_v40, 0.0  ;;  %vm812_vm1 = vcmp.gt.f32.partialorder %v3605_v35, 0.0 }
 0x3c8   :  { %3061 = vpow2.f32 %v860_v2  ;;  %v856_v32 = vmul.f32 1.442695, %v827_v3  ;;  %v2386_v5 = vadd.f32 -1.0, %v3050_v30  ;;  %v885_v42 = vsel %vm805_vm7, %v3579_v0, %v2388_v10 }
 0x3c9   :  { %3063 = vpow2.f32 %v858_v55  ;;  %v884_v18 = vsel %vm804_vm8, %v3571_v50, %v2387_v34 }
 0x3ca   :  { %3065 = vpow2.f32 %v856_v32  ;;  %v883_v24 = vsel %vm803_vm6, %v3583_v9, %v2386_v5  ;;  %v897_v39 = vpack.c.bf16 %v885_v42, %v884_v18 }
 0x3cb   :  { %v896_v25 = vpack.c.bf16 %v883_v24, %v882_v49  ;;  %v3052_v11 = vpop.eup %3051 }
 0x3cc   :  { %v2389_v20 = vadd.f32 -1.0, %v3052_v11 }
 0x3cd   :  { %v3054_v14 = vpop.eup %3053  ;;  %2774 = vmatprep.mubr.bf16.mxu0 %v896_v25 }
 0x3ce   :  { %v3056_v47 = vpop.eup %3055  ;;  %v2392_v26 = vadd.f32 -1.0, %v3054_v14  ;;  %v886_v0 = vsel %vm806_vm9, %v3591_v45, %v2389_v20 }
 0x3cf   :  { %v3058_v44 = vpop.eup %3057  ;;  %2775 = vmatmul.mubr.bf16.gmra.mxu0 %v897_v39  ;;  %v2391_v51 = vadd.f32 -1.0, %v3056_v47 }
 0x3d0   :  { %v2390_v31 = vadd.f32 -1.0, %v3058_v44  ;;  %v889_v50 = vsel %vm809_vm11, %v3594_v56, %v2392_v26 }
 0x3d1   :  { %v888_v48 = vsel %vm808_vm12, %v3587_v36, %v2391_v51  ;;  %v3661_v51 = vld [vmem:[#allocation8 + $0x8] sm:$0xff] }
 0x3d2   :  { %v887_v9 = vsel %vm807_vm10, %v3599_v13, %v2390_v31  ;;  %v899_v52 = vpack.c.bf16 %v889_v50, %v888_v48 }
 0x3d3   :  { %v898_v59 = vpack.c.bf16 %v887_v9, %v886_v0  ;;  %v1074_v0 = vpack.c.bf16 %v3661_v51, %v3661_v51 }
 0x3d4   :  { %v3060_v38 = vpop.eup %3059 }
 0x3d5   :  { %v3062_v60 = vpop.eup %3061  ;;  %2778 = vmatprep.mubr.bf16.mxu0 %v898_v59  ;;  %v2393_v54 = vadd.f32 -1.0, %v3060_v38 }
 0x3d6   :  { %v3064_v12 = vpop.eup %3063  ;;  %v2396_v37 = vadd.f32 -1.0, %v3062_v60 }
 0x3d7   :  { %v3066_v55 = vpop.eup %3065  ;;  %2779 = vmatmul.mubr.bf16.gmra.mxu0 %v899_v52  ;;  %v2395_v45 = vadd.f32 -1.0, %v3064_v12  ;;  %v890_v56 = vsel %vm810_vm13, %v3609_v19, %v2393_v54 }
 0x3d8   :  { %v2394_v61 = vadd.f32 -1.0, %v3066_v55  ;;  %v893_v36 = vsel %vm813_vm15, %v3612_v23, %v2396_v37 }
 0x3d9   :  { %v892_v27 = vsel %vm812_vm1, %v3605_v35, %v2395_v45 }
 0x3da   :  { %v891_v13 = vsel %vm811_vm14, %v3622_v40, %v2394_v61  ;;  %v901_v2 = vpack.c.bf16 %v893_v36, %v892_v27 }
 0x3db   :  { %v900_v62 = vpack.c.bf16 %v891_v13, %v890_v56 }
 0x3dd   :  { %2782 = vmatprep.mubr.bf16.mxu0 %v900_v62 }
 0x3df   :  { %2783 = vmatmul.mubr.bf16.gmra.mxu0 %v901_v2 }
 0x487   :  { %v2772_v3 = vpop.f32.mrf.mxu0 }
 0x488   :  { %1127 = vperm.xlu1 %2936, %v2772_v3  }
 0x489   :  { %v1001_v4 = vpop.f32.mrf.mxu0 }
 0x48b   :  { %v2773_v30 = vpop.f32.mrf.mxu0 }
 0x48c   :  { %1117 = vperm.xlu1 %2936, %v1001_v4   ;;  %v1065_v26 = vpack.c.bf16 %v2773_v30, %v2772_v3 }
 0x48d   :  { %v1004_v10 = vpop.f32.mrf.mxu0 }
 0x48e   :  { %1122 = vperm.xlu0 %2935, %v1004_v10   ;;  %v1064_v31 = vpack.c.bf16 %v1004_v10, %v1001_v4 }
 0x48f   :  { %v2776_v19 = vpop.f32.mrf.mxu0 }
 0x490   :  { %1132 = vperm.xlu1 %2936, %v2773_v30  }
 0x491   :  { %v1017_v40 = vpop.f32.mrf.mxu0 }
 0x492   :  { %1147 = vperm.xlu0 %2935, %v2776_v19  }
 0x493   :  { %v2777_v32 = vpop.f32.mrf.mxu0 }
 0x494   :  { %v1067_v20 = vpack.c.bf16 %v2777_v32, %v2776_v19 }
 0x495   :  { %v1020_v23 = vpop.f32.mrf.mxu0 }
 0x496   :  { %1137 = vperm.xlu0 %2935, %v1017_v40   ;;  %1142 = vperm.xlu1 %2936, %v1020_v23   ;;  %v1066_v44 = vpack.c.bf16 %v1020_v23, %v1017_v40 }
 0x497   :  { %v2780_v5 = vpop.f32.mrf.mxu0 }
 0x499   :  { %v1033_v34 = vpop.f32.mrf.mxu0 }
 0x49a   :  { %1152 = vperm.xlu1 %2936, %v2777_v32   ;;  %1167 = vperm.xlu0 %2935, %v2780_v5  }
 0x49b   :  { %v2781_v35 = vpop.f32.mrf.mxu0 }
 0x49c   :  { %v1069_v47 = vpack.c.bf16 %v2781_v35, %v2780_v5 }
 0x49d   :  { %v1036_v49 = vpop.f32.mrf.mxu0 }
 0x49e   :  { %1157 = vperm.xlu0 %2935, %v1033_v34   ;;  %1162 = vperm.xlu1 %2936, %v1036_v49   ;;  %v1068_v39 = vpack.c.bf16 %v1036_v49, %v1033_v34 }
 0x49f   :  { %v2784_v24 = vpop.f32.mrf.mxu0 }
 0x4a1   :  { %v1049_v25 = vpop.f32.mrf.mxu0 }
 0x4a2   :  { %1172 = vperm.xlu1 %2936, %v2781_v35   ;;  %1187 = vperm.xlu0 %2935, %v2784_v24  }
 0x4a3   :  { %v2785_v42 = vpop.f32.mrf.mxu0 }
 0x4a4   :  { %v1071_v11 = vpack.c.bf16 %v2785_v42, %v2784_v24 }
 0x4a5   :  { %v1052_v14 = vpop.f32.mrf.mxu0 }
 0x4a6   :  { %v1070_v18 = vpack.c.bf16 %v1052_v14, %v1049_v25  ;;  %1177 = vperm.xlu0 %2935, %v1049_v25   ;;  %2787 = vmatpush3.bf16.xpose.msra.mxu1 %v1071_v11 }
 0x4a7   :  { %2806 = vmatprep.subr.bf16.mxu0 %v1071_v11  ;;  %1182 = vperm.xlu1 %2936, %v1052_v14  }
 0x4a8   :  { %2807 = vmatpush3.bf16.msra.mxu0 %v1071_v11  ;;  %2788 = vmatprep.subr.bf16.mxu1 %v3344_v17 }
 0x4a9   :  { %2808 = vmatprep.subr.bf16.mxu0 %v1070_v18 }
 0x4ab   :  { %1192 = vperm.xlu1 %2936, %v2785_v42  }
 0x4ac   :  { %2809 = vmatpush3.bf16.msra.mxu0 %v1070_v18 }
 0x4ad   :  { %2810 = vmatprep.subr.bf16.mxu0 %v1069_v47 }
 0x4ae   :  { %2789 = vmatpush3.bf16.xpose.msra.mxu1 %v1070_v18 }
 0x4af   :  { %2790 = vmatprep.subr.bf16.mxu1 %v3344_v17 }
 0x4b0   :  { %2811 = vmatpush3.bf16.msra.mxu0 %v1069_v47 }
 0x4b1   :  { %2812 = vmatprep.subr.bf16.mxu0 %v1068_v39 }
 0x4b4   :  { %2813 = vmatpush3.bf16.msra.mxu0 %v1068_v39 }
 0x4b5   :  { %2814 = vmatprep.subr.bf16.mxu0 %v1067_v20 }
 0x4b6   :  { %2791 = vmatpush3.bf16.xpose.msra.mxu1 %v1069_v47 }
 0x4b7   :  { %2792 = vmatprep.subr.bf16.mxu1 %v3344_v17 }
 0x4b8   :  { %2815 = vmatpush3.bf16.msra.mxu0 %v1067_v20 }
 0x4b9   :  { %2816 = vmatprep.subr.bf16.mxu0 %v1066_v44 }
 0x4bc   :  { %2817 = vmatpush3.bf16.msra.mxu0 %v1066_v44 }
 0x4bd   :  { %2818 = vmatprep.subr.bf16.mxu0 %v1065_v26 }
 0x4be   :  { %2793 = vmatpush3.bf16.xpose.msra.mxu1 %v1068_v39 }
 0x4bf   :  { %2794 = vmatprep.subr.bf16.mxu1 %v3344_v17 }
 0x4c0   :  { %2819 = vmatpush3.bf16.msra.mxu0 %v1065_v26 }
 0x4c1   :  { %2820 = vmatprep.subr.bf16.mxu0 %v1064_v31 }
 0x4c4   :  { %2821 = vmatpush3.bf16.msra.mxu0 %v1064_v31 }
 0x4c6   :  { %2795 = vmatpush3.bf16.xpose.msra.mxu1 %v1067_v20 }
 0x4c7   :  { %2796 = vmatprep.subr.bf16.mxu1 %v3344_v17 }
 0x4ce   :  { %2797 = vmatpush3.bf16.xpose.msra.mxu1 %v1066_v44 }
 0x4cf   :  { %2798 = vmatprep.subr.bf16.mxu1 %v3344_v17 }
 0x4d6   :  { %2799 = vmatpush3.bf16.xpose.msra.mxu1 %v1065_v26 }
 0x4d7   :  { %2800 = vmatprep.subr.bf16.mxu1 %v3344_v17 }
 0x4de   :  { %2801 = vmatpush3.bf16.xpose.msra.mxu1 %v1064_v31 }
 0x4df   :  { %2870 = vmatprep.subr.bf16.mxu1 %v3344_v17 }
 0x4e5   :  { %2803 = vmatmul.mubr.bf16.vlgmr.msra.gmra.mxu1 %v1074_v0 }
 0x4e6   :  { %2886 = vmatprep.mubr.msk.bf16.mxu1 %vm3345_vm0, %v3344_v17 }
 0x503   :  { %v1128_v59 = vpop.permute.xlu1 %1127 }
 0x507   :  { %v1118_v38 = vpop.permute.xlu1 %1117 }
 0x509   :  { %v1123_v9 = vpop.permute.xlu0 %1122 }
 0x50b   :  { %v1133_v48 = vpop.permute.xlu1 %1132 }
 0x50d   :  { %v1148_v50 = vpop.permute.xlu0 %1147 }
 0x511   :  { %v1138_v60 = vpop.permute.xlu0 %1137  ;;  %v1143_v12 = vpop.permute.xlu1 %1142 }
 0x515   :  { %v1168_v52 = vpop.permute.xlu0 %1167  ;;  %v1153_v61 = vpop.permute.xlu1 %1152 }
 0x519   :  { %v1158_v36 = vpop.permute.xlu0 %1157  ;;  %v1163_v24 = vpop.permute.xlu1 %1162 }
 0x51d   :  { %v1188_v18 = vpop.permute.xlu0 %1187 }
 0x5a5   :  { %v1109_v54 = vpop.f32.mrf.mxu1 }
 0x5a6   :  { %v3669_v55 = vrot.slane %v1109_v54, %v3414_v53 }
 0x5a7   :  { %v2804_v37 = vpop.f32.mrf.mxu1 }
 0x5a8   :  { %v1200_v45 = vadd.f32 %v3669_v55, %v1123_v9  ;;  %v1199_v56 = vadd.f32 %v3669_v55, %v1118_v38  ;;  %v1203_v13 = vadd.f32 %v3669_v55, %v1138_v60  ;;  %v1201_v62 = vadd.f32 %v3669_v55, %v1128_v59  ;;  %v1173_v59 = vpop.permute.xlu1 %1172 }
 0x5a9   :  { %v1112_v27 = vpop.f32.mrf.mxu1  ;;  %v1205_v2 = vadd.f32 %v3669_v55, %v1148_v50  ;;  %v1202_v3 = vadd.f32 %v3669_v55, %v1133_v48  ;;  %v1207_v35 = vadd.f32 %v3669_v55, %v1158_v36  ;;  %v1204_v49 = vadd.f32 %v3669_v55, %v1143_v12  ;;  %v1178_v50 = vpop.permute.xlu0 %1177 }
 0x5aa   :  { %v1216_v4 = vmul.f32 0.2, %v1200_v45  ;;  %v1215_v30 = vmul.f32 0.2, %v1199_v56  ;;  %v1219_v10 = vmul.f32 0.2, %v1203_v13  ;;  %v1209_v0 = vadd.f32 %v3669_v55, %v1168_v52 }
 0x5ab   :  { %v2805_v19 = vpop.f32.mrf.mxu1  ;;  %v1217_v40 = vmul.f32 0.2, %v1201_v62  ;;  %v1221_v5 = vmul.f32 0.2, %v1205_v2  ;;  %v1218_v34 = vmul.f32 0.2, %v1202_v3  ;;  %v1206_v9 = vadd.f32 %v3669_v55, %v1153_v61 }
 0x5ac   :  { %v1232_v32 = vmax.f32 %v1200_v45, %v1216_v4  ;;  %v1231_v23 = vmax.f32 %v1199_v56, %v1215_v30  ;;  %v1235_v11 = vmax.f32 %v1203_v13, %v1219_v10  ;;  %v1223_v20 = vmul.f32 0.2, %v1207_v35  ;;  %v1183_v36 = vpop.permute.xlu1 %1182 }
 0x5ad   :  { %v1233_v14 = vmax.f32 %v1201_v62, %v1217_v40  ;;  %v1237_v47 = vmax.f32 %v1205_v2, %v1221_v5  ;;  %v1234_v39 = vmax.f32 %v1202_v3, %v1218_v34  ;;  %v1220_v44 = vmul.f32 0.2, %v1204_v49 }
 0x5ae   :  { %v3680_v25 = vadd.f32 %v3423_v1, %v1232_v32  ;;  %v3683_v42 = vadd.f32 %v3427_v8, %v1231_v23  ;;  %v3688_v26 = vadd.f32 %v3429_v15, %v1235_v11  ;;  %v1239_v48 = vmax.f32 %v1207_v35, %v1223_v20 }
 0x5af   :  { %v3691_v31 = vadd.f32 %v3431_v16, %v1233_v14  ;;  %v3698_v38 = vadd.f32 %v3443_v28, %v1237_v47  ;;  %v3701_v60 = vadd.f32 %v3445_v29, %v1234_v39  ;;  %v1236_v12 = vmax.f32 %v1204_v49, %v1220_v44 }
 0x5b0   :  { %1265 = vmax.xlane.f32.xlu1 %v3680_v25  ;;  %1263 = vmax.xlane.f32.xlu0 %v3683_v42  ;;  %v1225_v54 = vmul.f32 0.2, %v1209_v0  ;;  %v1222_v37 = vmul.f32 0.2, %v1206_v9  ;;  %v1211_v52 = vadd.f32 %v3669_v55, %v1178_v50  ;;  %v1208_v61 = vadd.f32 %v3669_v55, %v1163_v24  ;;  %v1193_v34 = vpop.permute.xlu1 %1192 }
 0x5b1   :  { %v3708_v45 = vadd.f32 %v3457_v41, %v1239_v48  ;;  %v3711_v56 = vadd.f32 %v3459_v43, %v1236_v12  ;;  %v1213_v13 = vadd.f32 %v3669_v55, %v1188_v18  ;;  %v1210_v62 = vadd.f32 %v3669_v55, %v1173_v59 }
 0x5b2   :  { %v1241_v27 = vmax.f32 %v1209_v0, %v1225_v54  ;;  %v1238_v2 = vmax.f32 %v1206_v9, %v1222_v37  ;;  %v1227_v3 = vmul.f32 0.2, %v1211_v52  ;;  %v1224_v4 = vmul.f32 0.2, %v1208_v61 }
 0x5b3   :  { %v1229_v30 = vmul.f32 0.2, %v1213_v13  ;;  %v1226_v10 = vmul.f32 0.2, %v1210_v62  ;;  %v1212_v19 = vadd.f32 %v3669_v55, %v1183_v36  ;;  %v1214_v49 = vadd.f32 %v3669_v55, %v1193_v34 }
 0x5b4   :  { %1271 = vmax.xlane.f32.xlu1 %v3688_v26  ;;  %1267 = vmax.xlane.f32.xlu0 %v3691_v31  ;;  %v3719_v40 = vadd.f32 %v3471_v57, %v1241_v27  ;;  %v1254_v32 = vadd.f32 %v3473_v58, %v1238_v2  ;;  %v1243_v23 = vmax.f32 %v1211_v52, %v1227_v3 }
 0x5b5   :  { %v1240_v5 = vmax.f32 %v1208_v61, %v1224_v4  ;;  %v1228_v35 = vmul.f32 0.2, %v1212_v19  ;;  %v1245_v14 = vmax.f32 %v1213_v13, %v1229_v30  ;;  %v1242_v18 = vmax.f32 %v1210_v62, %v1226_v10 }
 0x5b6   :  { %v3725_v24 = vadd.f32 %v3485_v6, %v1243_v23  ;;  %v1230_v55 = vmul.f32 0.2, %v1214_v49 }
 0x5b7   :  { %v3728_v11 = vadd.f32 %v3487_v7, %v1240_v5  ;;  %v3733_v47 = vadd.f32 %v3498_v21, %v1245_v14  ;;  %v3736_v39 = vadd.f32 %v3500_v22, %v1242_v18  ;;  %v1244_v20 = vmax.f32 %v1212_v19, %v1228_v35 }
 0x5b8   :  { %1275 = vmax.xlane.f32.xlu1 %v3698_v38  ;;  %1269 = vmax.xlane.f32.xlu0 %v3701_v60  ;;  %v1246_v0 = vmax.f32 %v1214_v49, %v1230_v55 }
 0x5b9   :  { %v3741_v44 = vadd.f32 %v3511_v33, %v1244_v20 }
 0x5ba   :  { %v3745_v9 = vadd.f32 %v3524_v46, %v1246_v0 }
 0x5bc   :  { %1279 = vmax.xlane.f32.xlu1 %v3708_v45  ;;  %1273 = vmax.xlane.f32.xlu0 %v3711_v56 }
 0x5c0   :  { %1283 = vmax.xlane.f32.xlu1 %v3719_v40  ;;  %1277 = vmax.xlane.f32.xlu0 %v1254_v32 }
 0x5c4   :  { %1287 = vmax.xlane.f32.xlu1 %v3725_v24  ;;  %1281 = vmax.xlane.f32.xlu0 %v3728_v11 }
 0x5c8   :  { %1291 = vmax.xlane.f32.xlu1 %v3733_v47  ;;  %1285 = vmax.xlane.f32.xlu0 %v3736_v39 }
 0x5cc   :  { %1289 = vmax.xlane.f32.xlu0 %v3741_v44 }
 0x5d0   :  { %1293 = vmax.xlane.f32.xlu0 %v3745_v9 }
 0x639   :  { %v1266_v59 = vpop.xlane.xlu1 %1265  ;;  %v1264_v50 = vpop.xlane.xlu0 %1263 }
 0x63a   :  { %v1296_v48 = vsub.f32 %v3680_v25, %v1266_v59  ;;  %v1295_v12 = vsub.f32 %v3683_v42, %v1264_v50 }
 0x63c   :  { %v1313_v54 = vmul.f32 1.442695, %v1296_v48  ;;  %v1311_v37 = vmul.f32 1.442695, %v1295_v12 }
 0x63d   :  { %v1272_v52 = vpop.xlane.xlu1 %1271  ;;  %v1268_v61 = vpop.xlane.xlu0 %1267 }
 0x63e   :  { %3067 = vpow2.f32 %v1313_v54  ;;  %v1299_v13 = vsub.f32 %v3688_v26, %v1272_v52  ;;  %v1297_v62 = vsub.f32 %v3691_v31, %v1268_v61 }
 0x63f   :  { %3069 = vpow2.f32 %v1311_v37 }
 0x640   :  { %v1315_v36 = vmul.f32 1.442695, %v1297_v62  ;;  %v1319_v3 = vmul.f32 1.442695, %v1299_v13 }
 0x641   :  { %v1276_v27 = vpop.xlane.xlu1 %1275  ;;  %v1270_v2 = vpop.xlane.xlu0 %1269 }
 0x642   :  { %v1301_v4 = vsub.f32 %v3698_v38, %v1276_v27  ;;  %v1298_v25 = vsub.f32 %v3701_v60, %v1270_v2  ;;  %3071 = vpow2.f32 %v1315_v36 }
 0x643   :  { %3073 = vpow2.f32 %v1319_v3 }
 0x644   :  { %v1317_v42 = vmul.f32 1.442695, %v1298_v25  ;;  %v1323_v19 = vmul.f32 1.442695, %v1301_v4 }
 0x645   :  { %v1280_v30 = vpop.xlane.xlu1 %1279  ;;  %v1274_v10 = vpop.xlane.xlu0 %1273 }
 0x646   :  { %v1303_v23 = vsub.f32 %v3708_v45, %v1280_v30  ;;  %v1300_v26 = vsub.f32 %v3711_v56, %v1274_v10  ;;  %3075 = vpow2.f32 %v1317_v42 }
 0x647   :  { %3077 = vpow2.f32 %v1323_v19 }
 0x648   :  { %v1321_v31 = vmul.f32 1.442695, %v1300_v26  ;;  %v1327_v35 = vmul.f32 1.442695, %v1303_v23 }
 0x649   :  { %v1284_v5 = vpop.xlane.xlu1 %1283  ;;  %v1278_v34 = vpop.xlane.xlu0 %1277 }
 0x64a   :  { %v1305_v38 = vsub.f32 %v3719_v40, %v1284_v5  ;;  %v1302_v49 = vsub.f32 %v1254_v32, %v1278_v34  ;;  %3079 = vpow2.f32 %v1321_v31 }
 0x64b   :  { %v3068_v60 = vpop.eup %3067  ;;  %3081 = vpow2.f32 %v1327_v35 }
 0x64c   :  { %v3070_v14 = vpop.eup %3069  ;;  %v1325_v18 = vmul.f32 1.442695, %v1302_v49  ;;  %1345 = vadd.xlane.f32.xlu0 %v3068_v60  ;;  %v1331_v56 = vmul.f32 1.442695, %v1305_v38 }
 0x64d   :  { %1343 = vadd.xlane.f32.xlu1 %v3070_v14  ;;  %v1288_v20 = vpop.xlane.xlu1 %1287  ;;  %v1282_v55 = vpop.xlane.xlu0 %1281  ;;  %v1391_v45 = vpack.c.bf16 %v3068_v60, %v3070_v14  ;;  %v2963_v60 = vld [vmem:[#allocation7 + $0xb8] sm:$0xff]   ;;  %v2964_v14 = vld [vmem:[#allocation7 + $0xb0] sm:$0xff]  }
 0x64e   :  { %v1307_v0 = vsub.f32 %v3725_v24, %v1288_v20  ;;  %v1304_v59 = vsub.f32 %v3728_v11, %v1282_v55  ;;  %3083 = vpow2.f32 %v1325_v18  ;;  %2838 = vmatprep.subr.bf16.mxu0 %v2963_v60  ;;  %v2965_v18 = vld [vmem:[#allocation7 + $0xa8] sm:$0xff]   ;;  %v2966_v20 = vld [vmem:[#allocation7 + $0xa0] sm:$0xff]   ;;  %v2967_v55 = vld [vmem:[#allocation7 + $0x98] sm:$0xff]  }
 0x64f   :  { %2822 = vmatprep.mubr.bf16.mxu0 %v1391_v45  ;;  %v3072_v50 = vpop.eup %3071  ;;  %3085 = vpow2.f32 %v1331_v56  ;;  %v2968_v45 = vld [vmem:[#allocation7 + $0x90] sm:$0xff]   ;;  %v2969_v56 = vld [vmem:[#allocation7 + $0x88] sm:$0xff]  }
 0x650   :  { %v1329_v40 = vmul.f32 1.442695, %v1304_v59  ;;  %v1335_v12 = vmul.f32 1.442695, %v1307_v0  ;;  %v3074_v37 = vpop.eup %3073  ;;  %v2970_v0 = vld [vmem:[#allocation7 + $0x80] sm:$0xff]  }
 0x651   :  { %1347 = vadd.xlane.f32.xlu1 %v3072_v50  ;;  %v1292_v32 = vpop.xlane.xlu1 %1291  ;;  %v1286_v48 = vpop.xlane.xlu0 %1285 }
 0x652   :  { %v1306_v54 = vsub.f32 %v3736_v39, %v1286_v48  ;;  %3087 = vpow2.f32 %v1329_v40  ;;  %v1309_v52 = vsub.f32 %v3733_v47, %v1292_v32 }
 0x653   :  { %v3076_v61 = vpop.eup %3075  ;;  %3089 = vpow2.f32 %v1335_v12 }
 0x654   :  { %v1333_v13 = vmul.f32 1.442695, %v1306_v54  ;;  %1349 = vadd.xlane.f32.xlu0 %v3076_v61  ;;  %v1392_v11 = vpack.c.bf16 %v3076_v61, %v3072_v50  ;;  %v3078_v36 = vpop.eup %3077  ;;  %v1339_v27 = vmul.f32 1.442695, %v1309_v52 }
 0x655   :  { %1351 = vadd.xlane.f32.xlu1 %v3074_v37  ;;  %v1290_v24 = vpop.xlane.xlu0 %1289 }
 0x656   :  { %v1308_v62 = vsub.f32 %v3741_v44, %v1290_v24  ;;  %3091 = vpow2.f32 %v1333_v13  ;;  %2823 = vmatmul.mubr.bf16.vlgmr.msra.gmra.mxu0 %v1392_v11  ;;  %v3765_v24 = vrot.slane %v3661_v51, %v3548_v63 }
 0x657   :  { %v3080_v2 = vpop.eup %3079  ;;  %2839 = vmatpush3.bf16.msra.mxu0 %v2963_v60 }
 0x658   :  { %v1337_v3 = vmul.f32 1.442695, %v1308_v62  ;;  %1353 = vadd.xlane.f32.xlu0 %v3080_v2  ;;  %v1393_v4 = vpack.c.bf16 %v3080_v2, %v3074_v37  ;;  %v3082_v25 = vpop.eup %3081  ;;  %2840 = vmatprep.subr.bf16.mxu0 %v2964_v14 }
 0x659   :  { %1355 = vadd.xlane.f32.xlu1 %v3078_v36  ;;  %v1294_v39 = vpop.xlane.xlu0 %1293 }
 0x65a   :  { %3093 = vpow2.f32 %v1337_v3  ;;  %v1310_v47 = vsub.f32 %v3745_v9, %v1294_v39  ;;  %2826 = vmatprep.mubr.bf16.mxu0 %v1393_v4 }
 0x65b   :  { %3095 = vpow2.f32 %v1339_v27  ;;  %v3084_v42 = vpop.eup %3083  ;;  %2841 = vmatpush3.bf16.msra.mxu0 %v2964_v14 }
 0x65c   :  { %v1341_v30 = vmul.f32 1.442695, %v1310_v47  ;;  %1357 = vadd.xlane.f32.xlu0 %v3084_v42  ;;  %v1394_v44 = vpack.c.bf16 %v3084_v42, %v3078_v36  ;;  %v3086_v10 = vpop.eup %3085  ;;  %2842 = vmatprep.subr.bf16.mxu0 %v2965_v18 }
 0x65d   :  { %1359 = vadd.xlane.f32.xlu1 %v3082_v25 }
 0x65e   :  { %3097 = vpow2.f32 %v1341_v30  ;;  %2827 = vmatmul.mubr.bf16.gmra.mxu0 %v1394_v44 }
 0x65f   :  { %v3088_v19 = vpop.eup %3087  ;;  %2843 = vmatpush3.bf16.msra.mxu0 %v2965_v18 }
 0x660   :  { %1361 = vadd.xlane.f32.xlu0 %v3088_v19  ;;  %v1395_v23 = vpack.c.bf16 %v3088_v19, %v3082_v25  ;;  %v3090_v26 = vpop.eup %3089  ;;  %2844 = vmatprep.subr.bf16.mxu0 %v2966_v20 }
 0x661   :  { %1363 = vadd.xlane.f32.xlu1 %v3086_v10 }
 0x662   :  { %2830 = vmatprep.mubr.bf16.mxu0 %v1395_v23 }
 0x663   :  { %v3092_v31 = vpop.eup %3091  ;;  %2845 = vmatpush3.bf16.msra.mxu0 %v2966_v20 }
 0x664   :  { %1365 = vadd.xlane.f32.xlu0 %v3092_v31  ;;  %v1396_v9 = vpack.c.bf16 %v3092_v31, %v3086_v10  ;;  %2846 = vmatprep.subr.bf16.mxu0 %v2967_v55 }
 0x665   :  { %1367 = vadd.xlane.f32.xlu1 %v3090_v26 }
 0x666   :  { %2831 = vmatmul.mubr.bf16.gmra.mxu0 %v1396_v9 }
 0x667   :  { %v3094_v5 = vpop.eup %3093  ;;  %2847 = vmatpush3.bf16.msra.mxu0 %v2967_v55 }
 0x668   :  { %v3096_v34 = vpop.eup %3095  ;;  %v1397_v35 = vpack.c.bf16 %v3094_v5, %v3090_v26  ;;  %1369 = vadd.xlane.f32.xlu0 %v3094_v5  ;;  %2848 = vmatprep.subr.bf16.mxu0 %v2968_v45 }
 0x669   :  { %1371 = vadd.xlane.f32.xlu1 %v3096_v34 }
 0x66a   :  { %2834 = vmatprep.mubr.bf16.mxu0 %v1397_v35 }
 0x66b   :  { %v3098_v38 = vpop.eup %3097  ;;  %2849 = vmatpush3.bf16.msra.mxu0 %v2968_v45 }
 0x66c   :  { %v1398_v49 = vpack.c.bf16 %v3098_v38, %v3096_v34  ;;  %1373 = vadd.xlane.f32.xlu0 %v3098_v38  ;;  %2850 = vmatprep.subr.bf16.mxu0 %v2969_v56 }
 0x66e   :  { %2835 = vmatmul.mubr.bf16.gmra.mxu0 %v1398_v49 }
 0x66f   :  { %2851 = vmatpush3.bf16.msra.mxu0 %v2969_v56 }
 0x670   :  { %2852 = vmatprep.subr.bf16.mxu0 %v2970_v0 }
 0x673   :  { %2853 = vmatpush3.bf16.msra.mxu0 %v2970_v0 }
 0x6d5   :  { %v1346_v50 = vpop.xlane.xlu0 %1345 }
 0x6d6   :  { %v1344_v59 = vpop.xlane.xlu1 %1343 }
 0x6da   :  { %v1348_v40 = vpop.xlane.xlu1 %1347 }
 0x6db   :  { %3099 = vrcp.f32 %v1348_v40 }
 0x6dc   :  { %3101 = vrcp.f32 %v1344_v59 }
 0x6dd   :  { %v1350_v32 = vpop.xlane.xlu0 %1349 }
 0x6de   :  { %v1352_v48 = vpop.xlane.xlu1 %1351  ;;  %3103 = vrcp.f32 %v1350_v32 }
 0x6df   :  { %3105 = vrcp.f32 %v1346_v50 }
 0x6e1   :  { %v1354_v12 = vpop.xlane.xlu0 %1353 }
 0x6e2   :  { %v1356_v54 = vpop.xlane.xlu1 %1355 }
 0x6e3   :  { %3107 = vrcp.f32 %v1356_v54 }
 0x6e4   :  { %3109 = vrcp.f32 %v1352_v48 }
 0x6e5   :  { %v1358_v37 = vpop.xlane.xlu0 %1357 }
 0x6e6   :  { %v1360_v52 = vpop.xlane.xlu1 %1359  ;;  %3111 = vrcp.f32 %v1358_v37 }
 0x6e7   :  { %3113 = vrcp.f32 %v1354_v12 }
 0x6e8   :  { %v3100_v11 = vpop.eup %3099 }
 0x6e9   :  { %v1362_v61 = vpop.xlane.xlu0 %1361  ;;  %v3102_v2 = vpop.eup %3101 }
 0x6ea   :  { %v1364_v13 = vpop.xlane.xlu1 %1363 }
 0x6eb   :  { %v3104_v25 = vpop.eup %3103  ;;  %3115 = vrcp.f32 %v1364_v13 }
 0x6ec   :  { %3117 = vrcp.f32 %v1360_v52  ;;  %v3106_v23 = vpop.eup %3105 }
 0x6ed   :  { %v1366_v62 = vpop.xlane.xlu0 %1365 }
 0x6ee   :  { %v1368_v3 = vpop.xlane.xlu1 %1367  ;;  %3119 = vrcp.f32 %v1366_v62 }
 0x6ef   :  { %3121 = vrcp.f32 %v1362_v61 }
 0x6f0   :  { %v3108_v35 = vpop.eup %3107  ;;  %3123 = vrcp.f32 %v1368_v3 }
 0x6f1   :  { %v1370_v44 = vpop.xlane.xlu0 %1369  ;;  %v3110_v60 = vpop.eup %3109 }
 0x6f2   :  { %v1372_v9 = vpop.xlane.xlu1 %1371 }
 0x6f3   :  { %3125 = vrcp.f32 %v1372_v9  ;;  %v3112_v0 = vpop.eup %3111 }
 0x6f4   :  { %v3114_v54 = vpop.eup %3113 }
 0x6f5   :  { %v1374_v59 = vpop.xlane.xlu0 %1373 }
 0x716   :  { %v2824_v36 = vpop.f32.mrf.mxu0 }
 0x717   :  { %v1498_v27 = vmul.f32 %v3100_v11, %v2824_v36 }
 0x718   :  { %v1433_v39 = vpop.f32.mrf.mxu0 }
 0x719   :  { %v3768_v4 = vadd.f32 %v3765_v24, %v1498_v27  ;;  %v1496_v47 = vmul.f32 %v3102_v2, %v1433_v39  ;;  %v3116_v27 = vpop.eup %3115 }
 0x71a   :  { %v2825_v42 = vpop.f32.mrf.mxu0 }
 0x71b   :  { %v3771_v30 = vadd.f32 %v3765_v24, %v1496_v47  ;;  %v1499_v51 = vmul.f32 %v3104_v25, %v2825_v42  ;;  %v1550_v10 = vmin.f32 %v3768_v4, 0.0  ;;  %vm1534_vm0 = vcmp.gt.f32.partialorder %v3768_v4, 0.0 }
 0x71c   :  { %v1436_v19 = vpop.f32.mrf.mxu0 }
 0x71d   :  { %v1548_v26 = vmin.f32 %v3771_v30, 0.0  ;;  %v3776_v31 = vadd.f32 %v3765_v24, %v1499_v51  ;;  %v1497_v5 = vmul.f32 %v3106_v23, %v1436_v19  ;;  %v1568_v14 = vmul.f32 1.442695, %v1550_v10  ;;  %v3118_v51 = vpop.eup %3117 }
 0x71e   :  { %v2828_v34 = vpop.f32.mrf.mxu0  ;;  %v3120_v23 = vpop.eup %3119  ;;  %vm1532_vm3 = vcmp.gt.f32.partialorder %v3771_v30, 0.0 }
 0x71f   :  { %v1564_v38 = vmul.f32 1.442695, %v1548_v26  ;;  %v1551_v49 = vmin.f32 %v3776_v31, 0.0  ;;  %v3780_v18 = vadd.f32 %v3765_v24, %v1497_v5  ;;  %v1502_v20 = vmul.f32 %v3108_v35, %v2828_v34  ;;  %v3122_v35 = vpop.eup %3121 }
 0x720   :  { %v1449_v55 = vpop.f32.mrf.mxu0  ;;  %vm1535_vm2 = vcmp.gt.f32.partialorder %v3776_v31, 0.0 }
 0x721   :  { %v1570_v45 = vmul.f32 1.442695, %v1551_v49  ;;  %v1500_v56 = vmul.f32 %v3110_v60, %v1449_v55  ;;  %3127 = vpow2.f32 %v1564_v38  ;;  %v1549_v50 = vmin.f32 %v3780_v18, 0.0 }
 0x722   :  { %v3784_v40 = vadd.f32 %v3765_v24, %v1502_v20  ;;  %v2829_v32 = vpop.f32.mrf.mxu0  ;;  %vm1533_vm4 = vcmp.gt.f32.partialorder %v3780_v18, 0.0 }
 0x723   :  { %3129 = vpow2.f32 %v1570_v45  ;;  %v3787_v48 = vadd.f32 %v3765_v24, %v1500_v56  ;;  %v1503_v12 = vmul.f32 %v3112_v0, %v2829_v32  ;;  %v1566_v37 = vmul.f32 1.442695, %v1549_v50 }
 0x724   :  { %3131 = vpow2.f32 %v1568_v14  ;;  %v1554_v52 = vmin.f32 %v3784_v40, 0.0  ;;  %v1452_v61 = vpop.f32.mrf.mxu0  ;;  %v3124_v14 = vpop.eup %3123  ;;  %vm1538_vm8 = vcmp.gt.f32.partialorder %v3784_v40, 0.0 }
 0x725   :  { %3133 = vrcp.f32 %v1374_v59  ;;  %v1552_v13 = vmin.f32 %v3787_v48, 0.0  ;;  %v3792_v11 = vadd.f32 %v3765_v24, %v1503_v12  ;;  %v1501_v62 = vmul.f32 %v3114_v54, %v1452_v61  ;;  %v3126_v45 = vpop.eup %3125 }
 0x726   :  { %3135 = vpow2.f32 %v1566_v37  ;;  %v2832_v36 = vpop.f32.mrf.mxu0  ;;  %v1576_v47 = vmul.f32 1.442695, %v1554_v52  ;;  %vm1536_vm5 = vcmp.gt.f32.partialorder %v3787_v48, 0.0 }
 0x727   :  { %3137 = vrcp.f32 %v1370_v44  ;;  %v1572_v2 = vmul.f32 1.442695, %v1552_v13  ;;  %v1555_v3 = vmin.f32 %v3792_v11, 0.0  ;;  %v3796_v39 = vadd.f32 %v3765_v24, %v1501_v62 }
 0x728   :  { %v1506_v25 = vmul.f32 %v3116_v27, %v2832_v36  ;;  %v1465_v42 = vpop.f32.mrf.mxu0  ;;  %vm1539_vm7 = vcmp.gt.f32.partialorder %v3792_v11, 0.0 }
 0x729   :  { %3139 = vpow2.f32 %v1572_v2  ;;  %v1578_v10 = vmul.f32 1.442695, %v1555_v3  ;;  %v1553_v19 = vmin.f32 %v3796_v39, 0.0  ;;  %v1504_v9 = vmul.f32 %v3118_v51, %v1465_v42 }
 0x72a   :  { %v3800_v26 = vadd.f32 %v3765_v24, %v1506_v25  ;;  %v2833_v44 = vpop.f32.mrf.mxu0  ;;  %vm1537_vm6 = vcmp.gt.f32.partialorder %v3796_v39, 0.0 }
 0x72b   :  { %3141 = vpow2.f32 %v1578_v10  ;;  %v1574_v5 = vmul.f32 1.442695, %v1553_v19  ;;  %v1507_v34 = vmul.f32 %v3120_v23, %v2833_v44  ;;  %v3804_v49 = vadd.f32 %v3765_v24, %v1504_v9 }
 0x72c   :  { %3143 = vpow2.f32 %v1576_v47  ;;  %v1558_v38 = vmin.f32 %v3800_v26, 0.0  ;;  %v1468_v60 = vpop.f32.mrf.mxu0  ;;  %vm1542_vm12 = vcmp.gt.f32.partialorder %v3800_v26, 0.0 }
 0x72d   :  { %3145 = vpow2.f32 %v1574_v5  ;;  %v3807_v20 = vadd.f32 %v3765_v24, %v1507_v34  ;;  %v1505_v55 = vmul.f32 %v3122_v35, %v1468_v60  ;;  %v1556_v56 = vmin.f32 %v3804_v49, 0.0 }
 0x72e   :  { %v2836_v0 = vpop.f32.mrf.mxu0  ;;  %v3128_v59 = vpop.eup %3127  ;;  %v1584_v54 = vmul.f32 1.442695, %v1558_v38  ;;  %vm1540_vm9 = vcmp.gt.f32.partialorder %v3804_v49, 0.0 }
 0x72f   :  { %v1559_v50 = vmin.f32 %v3807_v20, 0.0  ;;  %v3812_v32 = vadd.f32 %v3765_v24, %v1505_v55  ;;  %v1580_v37 = vmul.f32 1.442695, %v1556_v56  ;;  %v1510_v52 = vmul.f32 %v3126_v45, %v2836_v0 }
 0x730   :  { %v3130_v12 = vpop.eup %3129  ;;  %v1481_v61 = vpop.f32.mrf.mxu0  ;;  %v2405_v19 = vadd.f32 -1.0, %v3128_v59  ;;  %vm1543_vm11 = vcmp.gt.f32.partialorder %v3807_v20, 0.0 }
 0x731   :  { %v3132_v13 = vpop.eup %3131  ;;  %v1586_v62 = vmul.f32 1.442695, %v1559_v50  ;;  %v1557_v36 = vmin.f32 %v3812_v32, 0.0  ;;  %v2408_v2 = vadd.f32 -1.0, %v3130_v12  ;;  %3147 = vpow2.f32 %v1580_v37 }
 0x732   :  { %v3134_v27 = vpop.eup %3133  ;;  %v3818_v3 = vadd.f32 %v3765_v24, %v1510_v52  ;;  %v1508_v47 = vmul.f32 %v3124_v14, %v1481_v61  ;;  %v2837_v25 = vpop.f32.mrf.mxu0  ;;  %v2407_v9 = vadd.f32 -1.0, %v3132_v13  ;;  %v1612_v59 = vsel %vm1532_vm3, %v3771_v30, %v2405_v19 }
 0x733   :  { %v3136_v42 = vpop.eup %3135  ;;  %3149 = vpow2.f32 %v1586_v62  ;;  %v1582_v51 = vmul.f32 1.442695, %v1557_v36  ;;  %v1511_v10 = vmul.f32 %v3134_v27, %v2837_v25  ;;  %v1615_v55 = vsel %vm1535_vm2, %v3776_v31, %v2408_v2 }
 0x734   :  { %v3138_v23 = vpop.eup %3137  ;;  %3151 = vpow2.f32 %v1584_v54  ;;  %v1562_v44 = vmin.f32 %v3818_v3, 0.0  ;;  %v3822_v5 = vadd.f32 %v3765_v24, %v1508_v47  ;;  %v1484_v34 = vpop.f32.mrf.mxu0  ;;  %v2406_v60 = vadd.f32 -1.0, %v3136_v42 }
 0x735   :  { %3153 = vpow2.f32 %v1582_v51  ;;  %v3825_v35 = vadd.f32 %v3765_v24, %v1511_v10  ;;  %v1509_v38 = vmul.f32 %v3138_v23, %v1484_v34  ;;  %v1614_v54 = vsel %vm1534_vm0, %v3768_v4, %v2407_v9 }
 0x736   :  { %v3140_v14 = vpop.eup %3139  ;;  %v1560_v45 = vmin.f32 %v3822_v5, 0.0  ;;  %v1613_v50 = vsel %vm1533_vm4, %v3780_v18, %v2406_v60  ;;  %v1592_v37 = vmul.f32 1.442695, %v1562_v44  ;;  %v1629_v13 = vpack.c.bf16 %v1615_v55, %v1614_v54 }
 0x737   :  { %v1563_v56 = vmin.f32 %v3825_v35, 0.0  ;;  %v3835_v0 = vadd.f32 %v3765_v24, %v1509_v38  ;;  %v1628_v52 = vpack.c.bf16 %v1613_v50, %v1612_v59  ;;  %v2409_v27 = vadd.f32 -1.0, %v3140_v14 }
 0x738   :  { %v3142_v12 = vpop.eup %3141  ;;  %v1588_v31 = vmul.f32 1.442695, %v1560_v45  ;;  %vm1541_vm10 = vcmp.gt.f32.partialorder %v3812_v32, 0.0  ;;  %vm1544_vm13 = vcmp.gt.f32.partialorder %v3822_v5, 0.0  ;;  %vm1547_vm15 = vcmp.gt.f32.partialorder %v3825_v35, 0.0 }
 0x739   :  { %v3144_v61 = vpop.eup %3143  ;;  %v1594_v62 = vmul.f32 1.442695, %v1563_v56  ;;  %v1561_v36 = vmin.f32 %v3835_v0, 0.0  ;;  %2854 = vmatprep.mubr.bf16.mxu0 %v1628_v52  ;;  %v2412_v30 = vadd.f32 -1.0, %v3142_v12  ;;  %v1616_v47 = vsel %vm1536_vm5, %v3787_v48, %v2409_v27 }
 0x73a   :  { %v3146_v24 = vpop.eup %3145  ;;  %3155 = vpow2.f32 %v1588_v31  ;;  %2855 = vmatmul.mubr.bf16.vlgmr.msra.gmra.mxu0 %v1629_v13  ;;  %v2411_v4 = vadd.f32 -1.0, %v3144_v61  ;;  %vm1545_vm14 = vcmp.gt.f32.partialorder %v3835_v0, 0.0  ;;  %vm1546_vm1 = vcmp.gt.f32.partialorder %v3818_v3, 0.0 }
 0x73b   :  { %3157 = vpow2.f32 %v1594_v62  ;;  %v1590_v18 = vmul.f32 1.442695, %v1561_v36  ;;  %v2410_v2 = vadd.f32 -1.0, %v3146_v24  ;;  %v1619_v51 = vsel %vm1539_vm7, %v3792_v11, %v2412_v30 }
 0x73c   :  { %3159 = vpow2.f32 %v1592_v37  ;;  %v1618_v23 = vsel %vm1538_vm8, %v3784_v40, %v2411_v4  ;;  %v3346_v36 = vmov 8  }
 0x73d   :  { %3161 = vpow2.f32 %v1590_v18  ;;  %v1617_v25 = vsel %vm1537_vm6, %v3796_v39, %v2410_v2  ;;  %v1631_v44 = vpack.c.bf16 %v1619_v51, %v1618_v23  ;;  %2937 = vset.pattern.permute.xlu1 %v3346_v36  ;;  %2938 = vset.pattern.permute.xlu0 %v3346_v36 }
 0x73e   :  { %v1630_v42 = vpack.c.bf16 %v1617_v25, %v1616_v47  ;;  %v3148_v10 = vpop.eup %3147 }
 0x73f   :  { %v2413_v34 = vadd.f32 -1.0, %v3148_v10 }
 0x740   :  { %v3150_v19 = vpop.eup %3149  ;;  %2858 = vmatprep.mubr.bf16.mxu0 %v1630_v42 }
 0x741   :  { %v3152_v9 = vpop.eup %3151  ;;  %v2416_v60 = vadd.f32 -1.0, %v3150_v19  ;;  %v1620_v11 = vsel %vm1540_vm9, %v3804_v49, %v2413_v34 }
 0x742   :  { %v3154_v38 = vpop.eup %3153  ;;  %2859 = vmatmul.mubr.bf16.gmra.mxu0 %v1631_v44  ;;  %v2415_v48 = vadd.f32 -1.0, %v3152_v9 }
 0x743   :  { %v2414_v14 = vadd.f32 -1.0, %v3154_v38  ;;  %v1623_v40 = vsel %vm1543_vm11, %v3807_v20, %v2416_v60 }
 0x744   :  { %v1622_v59 = vsel %vm1542_vm12, %v3800_v26, %v2415_v48 }
 0x745   :  { %v1621_v39 = vsel %vm1541_vm10, %v3812_v32, %v2414_v14  ;;  %v1633_v12 = vpack.c.bf16 %v1623_v40, %v1622_v59 }
 0x746   :  { %v1632_v55 = vpack.c.bf16 %v1621_v39, %v1620_v11  ;;  %v3874_v11 = vld [vmem:[#allocation8 + $0x10] sm:$0xff] }
 0x747   :  { %v3156_v45 = vpop.eup %3155  ;;  %v1808_v39 = vpack.c.bf16 %v3874_v11, %v3874_v11 }
 0x748   :  { %v3158_v56 = vpop.eup %3157  ;;  %2862 = vmatprep.mubr.bf16.mxu0 %v1632_v55  ;;  %v2417_v54 = vadd.f32 -1.0, %v3156_v45 }
 0x749   :  { %v3160_v50 = vpop.eup %3159  ;;  %v2420_v31 = vadd.f32 -1.0, %v3158_v56 }
 0x74a   :  { %v3162_v37 = vpop.eup %3161  ;;  %2863 = vmatmul.mubr.bf16.gmra.mxu0 %v1633_v12  ;;  %v2419_v49 = vadd.f32 -1.0, %v3160_v50  ;;  %v1624_v20 = vsel %vm1544_vm13, %v3822_v5, %v2417_v54 }
 0x74b   :  { %v2418_v52 = vadd.f32 -1.0, %v3162_v37  ;;  %v1627_v26 = vsel %vm1547_vm15, %v3825_v35, %v2420_v31 }
 0x74c   :  { %v1626_v13 = vsel %vm1546_vm1, %v3818_v3, %v2419_v49 }
 0x74d   :  { %v1625_v32 = vsel %vm1545_vm14, %v3835_v0, %v2418_v52  ;;  %v1635_v62 = vpack.c.bf16 %v1627_v26, %v1626_v13 }
 0x74e   :  { %v1634_v61 = vpack.c.bf16 %v1625_v32, %v1624_v20 }
 0x750   :  { %2866 = vmatprep.mubr.bf16.mxu0 %v1634_v61 }
 0x752   :  { %2867 = vmatmul.mubr.bf16.gmra.mxu0 %v1635_v62 }
 0x7fa   :  { %v2856_v27 = vpop.f32.mrf.mxu0 }
 0x7fc   :  { %v1735_v24 = vpop.f32.mrf.mxu0 }
 0x7fd   :  { %1851 = vperm.xlu1 %2937, %v1735_v24  }
 0x7fe   :  { %v2857_v30 = vpop.f32.mrf.mxu0 }
 0x7ff   :  { %v1799_v14 = vpack.c.bf16 %v2857_v30, %v2856_v27 }
 0x800   :  { %v1738_v5 = vpop.f32.mrf.mxu0 }
 0x801   :  { %1861 = vperm.xlu1 %2937, %v2856_v27   ;;  %1856 = vperm.xlu0 %2938, %v1738_v5   ;;  %v1798_v48 = vpack.c.bf16 %v1738_v5, %v1735_v24 }
 0x802   :  { %v2860_v0 = vpop.f32.mrf.mxu0 }
 0x804   :  { %v1751_v18 = vpop.f32.mrf.mxu0 }
 0x805   :  { %1866 = vperm.xlu1 %2937, %v2857_v30  }
 0x806   :  { %v2861_v35 = vpop.f32.mrf.mxu0 }
 0x807   :  { %v1801_v38 = vpack.c.bf16 %v2861_v35, %v2860_v0 }
 0x808   :  { %v1754_v2 = vpop.f32.mrf.mxu0 }
 0x809   :  { %1881 = vperm.xlu1 %2937, %v2860_v0   ;;  %v1800_v60 = vpack.c.bf16 %v1754_v2, %v1751_v18 }
 0x80a   :  { %v2864_v4 = vpop.f32.mrf.mxu0 }
 0x80b   :  { %1901 = vperm.xlu0 %2938, %v2864_v4  }
 0x80c   :  { %v1767_v3 = vpop.f32.mrf.mxu0 }
 0x80d   :  { %1871 = vperm.xlu1 %2937, %v1751_v18  }
 0x80e   :  { %v2865_v47 = vpop.f32.mrf.mxu0 }
 0x80f   :  { %v1803_v44 = vpack.c.bf16 %v2865_v47, %v2864_v4 }
 0x810   :  { %v1770_v25 = vpop.f32.mrf.mxu0 }
 0x811   :  { %1886 = vperm.xlu1 %2937, %v2861_v35   ;;  %v1802_v34 = vpack.c.bf16 %v1770_v25, %v1767_v3 }
 0x812   :  { %v2868_v42 = vpop.f32.mrf.mxu0 }
 0x813   :  { %1921 = vperm.xlu0 %2938, %v2868_v42  }
 0x814   :  { %v1783_v51 = vpop.f32.mrf.mxu0 }
 0x815   :  { %1876 = vperm.xlu1 %2937, %v1754_v2  }
 0x816   :  { %v2869_v10 = vpop.f32.mrf.mxu0 }
 0x817   :  { %v1805_v19 = vpack.c.bf16 %v2869_v10, %v2868_v42  ;;  %1911 = vperm.xlu0 %2938, %v1783_v51  }
 0x818   :  { %v1786_v23 = vpop.f32.mrf.mxu0 }
 0x819   :  { %v1804_v9 = vpack.c.bf16 %v1786_v23, %v1783_v51  ;;  %1891 = vperm.xlu1 %2937, %v1767_v3   ;;  %2871 = vmatpush3.bf16.xpose.msra.mxu1 %v1805_v19 }
 0x81a   :  { %2890 = vmatprep.subr.bf16.mxu0 %v1805_v19  ;;  %2872 = vmatprep.subr.bf16.mxu1 %v3344_v17 }
 0x81b   :  { %2891 = vmatpush3.bf16.msra.mxu0 %v1805_v19 }
 0x81c   :  { %2892 = vmatprep.subr.bf16.mxu0 %v1804_v9 }
 0x81d   :  { %1896 = vperm.xlu1 %2937, %v1770_v25  }
 0x81f   :  { %2893 = vmatpush3.bf16.msra.mxu0 %v1804_v9 }
 0x820   :  { %2894 = vmatprep.subr.bf16.mxu0 %v1803_v44 }
 0x821   :  { %1906 = vperm.xlu1 %2937, %v2865_v47   ;;  %2873 = vmatpush3.bf16.xpose.msra.mxu1 %v1804_v9 }
 0x822   :  { %2874 = vmatprep.subr.bf16.mxu1 %v3344_v17 }
 0x823   :  { %2895 = vmatpush3.bf16.msra.mxu0 %v1803_v44 }
 0x824   :  { %2896 = vmatprep.subr.bf16.mxu0 %v1802_v34 }
 0x825   :  { %1916 = vperm.xlu1 %2937, %v1786_v23  }
 0x827   :  { %2897 = vmatpush3.bf16.msra.mxu0 %v1802_v34 }
 0x828   :  { %2898 = vmatprep.subr.bf16.mxu0 %v1801_v38 }
 0x829   :  { %1926 = vperm.xlu1 %2937, %v2869_v10   ;;  %2875 = vmatpush3.bf16.xpose.msra.mxu1 %v1803_v44 }
 0x82a   :  { %2876 = vmatprep.subr.bf16.mxu1 %v3344_v17 }
 0x82b   :  { %2899 = vmatpush3.bf16.msra.mxu0 %v1801_v38 }
 0x82c   :  { %2900 = vmatprep.subr.bf16.mxu0 %v1800_v60 }
 0x82f   :  { %2901 = vmatpush3.bf16.msra.mxu0 %v1800_v60 }
 0x830   :  { %2902 = vmatprep.subr.bf16.mxu0 %v1799_v14 }
 0x831   :  { %2877 = vmatpush3.bf16.xpose.msra.mxu1 %v1802_v34 }
 0x832   :  { %2878 = vmatprep.subr.bf16.mxu1 %v3344_v17 }
 0x833   :  { %2903 = vmatpush3.bf16.msra.mxu0 %v1799_v14 }
 0x834   :  { %2904 = vmatprep.subr.bf16.mxu0 %v1798_v48 }
 0x837   :  { %2905 = vmatpush3.bf16.msra.mxu0 %v1798_v48 }
 0x839   :  { %2879 = vmatpush3.bf16.xpose.msra.mxu1 %v1801_v38 }
 0x83a   :  { %2880 = vmatprep.subr.bf16.mxu1 %v3344_v17 }
 0x841   :  { %2881 = vmatpush3.bf16.xpose.msra.mxu1 %v1800_v60 }
 0x842   :  { %2882 = vmatprep.subr.bf16.mxu1 %v3344_v17 }
 0x849   :  { %2883 = vmatpush3.bf16.xpose.msra.mxu1 %v1799_v14 }
 0x84a   :  { %2884 = vmatprep.subr.bf16.mxu1 %v3344_v17 }
 0x851   :  { %2885 = vmatpush3.bf16.xpose.msra.mxu1 %v1798_v48 }
 0x858   :  { %2887 = vmatmul.mubr.bf16.vlgmr.msra.gmra.mxu1 %v1808_v39 }
 0x878   :  { %v1852_v55 = vpop.permute.xlu1 %1851 }
 0x87c   :  { %v1862_v40 = vpop.permute.xlu1 %1861  ;;  %v1857_v31 = vpop.permute.xlu0 %1856 }
 0x880   :  { %v1867_v45 = vpop.permute.xlu1 %1866 }
 0x884   :  { %v1882_v56 = vpop.permute.xlu1 %1881 }
 0x886   :  { %v1902_v24 = vpop.permute.xlu0 %1901 }
 0x888   :  { %v1872_v59 = vpop.permute.xlu1 %1871 }
 0x88c   :  { %v1887_v50 = vpop.permute.xlu1 %1886 }
 0x88e   :  { %v1922_v19 = vpop.permute.xlu0 %1921 }
 0x890   :  { %v1877_v12 = vpop.permute.xlu1 %1876 }
 0x892   :  { %v1912_v48 = vpop.permute.xlu0 %1911 }
 0x894   :  { %v1892_v52 = vpop.permute.xlu1 %1891 }
 0x898   :  { %v1897_v47 = vpop.permute.xlu1 %1896 }
 0x89c   :  { %v1907_v14 = vpop.permute.xlu1 %1906 }
 0x918   :  { %v1843_v54 = vpop.f32.mrf.mxu1 }
 0x919   :  { %v3879_v37 = vrot.slane %v1843_v54, %v3414_v53  ;;  %v1917_v54 = vpop.permute.xlu1 %1916 }
 0x91a   :  { %v2888_v17 = vpop.f32.mrf.mxu1 }
 0x91b   :  { %v1934_v49 = vadd.f32 %v3879_v37, %v1857_v31  ;;  %v1933_v20 = vadd.f32 %v3879_v37, %v1852_v55  ;;  %v1937_v32 = vadd.f32 %v3879_v37, %v1872_v59  ;;  %v1935_v61 = vadd.f32 %v3879_v37, %v1862_v40 }
 0x91c   :  { %v1846_v26 = vpop.f32.mrf.mxu1  ;;  %v1939_v13 = vadd.f32 %v3879_v37, %v1882_v56  ;;  %v1936_v62 = vadd.f32 %v3879_v37, %v1867_v45  ;;  %v1941_v4 = vadd.f32 %v3879_v37, %v1892_v52  ;;  %v1938_v3 = vadd.f32 %v3879_v37, %v1877_v12 }
 0x91d   :  { %v1950_v36 = vmul.f32 0.2, %v1934_v49  ;;  %v1949_v27 = vmul.f32 0.2, %v1933_v20  ;;  %v1953_v53 = vmul.f32 0.2, %v1937_v32  ;;  %v1940_v60 = vadd.f32 %v3879_v37, %v1887_v50 }
 0x91e   :  { %v2889_v30 = vpop.f32.mrf.mxu1  ;;  %v1951_v5 = vmul.f32 0.2, %v1935_v61  ;;  %v1955_v35 = vmul.f32 0.2, %v1939_v13  ;;  %v1952_v2 = vmul.f32 0.2, %v1936_v62  ;;  %v1945_v56 = vadd.f32 %v3879_v37, %v1912_v48 }
 0x91f   :  { %v1966_v0 = vmax.f32 %v1934_v49, %v1950_v36  ;;  %v1965_v18 = vmax.f32 %v1933_v20, %v1949_v27  ;;  %v1969_v51 = vmax.f32 %v1937_v32, %v1953_v53  ;;  %v1957_v44 = vmul.f32 0.2, %v1941_v4 }
 0x920   :  { %v1967_v10 = vmax.f32 %v1935_v61, %v1951_v5  ;;  %v1971_v23 = vmax.f32 %v1939_v13, %v1955_v35  ;;  %v1968_v9 = vmax.f32 %v1936_v62, %v1952_v2  ;;  %v1954_v34 = vmul.f32 0.2, %v1938_v3  ;;  %v1927_v62 = vpop.permute.xlu1 %1926 }
 0x921   :  { %v3890_v25 = vadd.f32 %v3423_v1, %v1966_v0  ;;  %v3893_v42 = vadd.f32 %v3427_v8, %v1965_v18  ;;  %v3898_v38 = vadd.f32 %v3429_v15, %v1969_v51  ;;  %v1943_v8 = vadd.f32 %v3879_v37, %v1902_v24 }
 0x922   :  { %v3901_v1 = vadd.f32 %v3431_v16, %v1967_v10  ;;  %v3908_v39 = vadd.f32 %v3443_v28, %v1971_v23  ;;  %v3911_v55 = vadd.f32 %v3445_v29, %v1968_v9  ;;  %v1973_v15 = vmax.f32 %v1941_v4, %v1957_v44 }
 0x923   :  { %1999 = vmax.xlane.f32.xlu1 %v3890_v25  ;;  %1997 = vmax.xlane.f32.xlu0 %v3893_v42  ;;  %v1970_v40 = vmax.f32 %v1938_v3, %v1954_v34  ;;  %v1959_v16 = vmul.f32 0.2, %v1943_v8  ;;  %v1956_v45 = vmul.f32 0.2, %v1940_v60  ;;  %v1942_v59 = vadd.f32 %v3879_v37, %v1897_v47 }
 0x924   :  { %v3918_v50 = vadd.f32 %v3457_v41, %v1973_v15  ;;  %v1947_v29 = vadd.f32 %v3879_v37, %v1922_v19  ;;  %v1944_v12 = vadd.f32 %v3879_v37, %v1907_v14  ;;  %v1961_v52 = vmul.f32 0.2, %v1945_v56 }
 0x925   :  { %v3921_v28 = vadd.f32 %v3459_v43, %v1970_v40  ;;  %v1975_v31 = vmax.f32 %v1943_v8, %v1959_v16  ;;  %v1972_v17 = vmax.f32 %v1940_v60, %v1956_v45  ;;  %v1958_v49 = vmul.f32 0.2, %v1942_v59 }
 0x926   :  { %v1963_v20 = vmul.f32 0.2, %v1947_v29  ;;  %v1960_v32 = vmul.f32 0.2, %v1944_v12  ;;  %v1946_v41 = vadd.f32 %v3879_v37, %v1917_v54  ;;  %v1977_v26 = vmax.f32 %v1945_v56, %v1961_v52 }
 0x927   :  { %2005 = vmax.xlane.f32.xlu1 %v3898_v38  ;;  %2001 = vmax.xlane.f32.xlu0 %v3901_v1  ;;  %v3929_v43 = vadd.f32 %v3471_v57, %v1975_v31  ;;  %v1988_v61 = vadd.f32 %v3473_v58, %v1972_v17  ;;  %v1974_v13 = vmax.f32 %v1942_v59, %v1958_v49 }
 0x928   :  { %v1962_v36 = vmul.f32 0.2, %v1946_v41  ;;  %v1948_v27 = vadd.f32 %v3879_v37, %v1927_v62  ;;  %v3935_v53 = vadd.f32 %v3485_v6, %v1977_v26  ;;  %v1979_v30 = vmax.f32 %v1947_v29, %v1963_v20 }
 0x929   :  { %v3938_v24 = vadd.f32 %v3487_v7, %v1974_v13  ;;  %v1976_v57 = vmax.f32 %v1944_v12, %v1960_v32 }
 0x92a   :  { %v3943_v58 = vadd.f32 %v3498_v21, %v1979_v30  ;;  %v1978_v0 = vmax.f32 %v1946_v41, %v1962_v36  ;;  %v1964_v37 = vmul.f32 0.2, %v1948_v27 }
 0x92b   :  { %2009 = vmax.xlane.f32.xlu1 %v3908_v39  ;;  %2003 = vmax.xlane.f32.xlu0 %v3911_v55  ;;  %v3946_v5 = vadd.f32 %v3500_v22, %v1976_v57 }
 0x92c   :  { %v3951_v6 = vadd.f32 %v3511_v33, %v1978_v0  ;;  %v1980_v7 = vmax.f32 %v1948_v27, %v1964_v37 }
 0x92e   :  { %v3955_v18 = vadd.f32 %v3524_v46, %v1980_v7 }
 0x92f   :  { %2013 = vmax.xlane.f32.xlu1 %v3918_v50  ;;  %2007 = vmax.xlane.f32.xlu0 %v3921_v28 }
 0x933   :  { %2017 = vmax.xlane.f32.xlu1 %v3929_v43  ;;  %2011 = vmax.xlane.f32.xlu0 %v1988_v61 }
 0x937   :  { %2021 = vmax.xlane.f32.xlu1 %v3935_v53  ;;  %2015 = vmax.xlane.f32.xlu0 %v3938_v24 }
 0x93b   :  { %2025 = vmax.xlane.f32.xlu1 %v3943_v58  ;;  %2019 = vmax.xlane.f32.xlu0 %v3946_v5 }
 0x93f   :  { %2023 = vmax.xlane.f32.xlu0 %v3951_v6 }
 0x943   :  { %2027 = vmax.xlane.f32.xlu0 %v3955_v18 }
 0x9ac   :  { %v2000_v21 = vpop.xlane.xlu1 %1999  ;;  %v1998_v22 = vpop.xlane.xlu0 %1997 }
 0x9ad   :  { %v2030_v35 = vsub.f32 %v3890_v25, %v2000_v21  ;;  %v2029_v2 = vsub.f32 %v3893_v42, %v1998_v22 }
 0x9af   :  { %v2047_v4 = vmul.f32 1.442695, %v2030_v35  ;;  %v2045_v3 = vmul.f32 1.442695, %v2029_v2 }
 0x9b0   :  { %v2006_v47 = vpop.xlane.xlu1 %2005  ;;  %v2002_v51 = vpop.xlane.xlu0 %2001 }
 0x9b1   :  { %3163 = vpow2.f32 %v2047_v4  ;;  %v2033_v33 = vsub.f32 %v3898_v38, %v2006_v47  ;;  %v2031_v10 = vsub.f32 %v3901_v1, %v2002_v51 }
 0x9b2   :  { %3165 = vpow2.f32 %v2045_v3 }
 0x9b3   :  { %v2049_v46 = vmul.f32 1.442695, %v2031_v10  ;;  %v2053_v9 = vmul.f32 1.442695, %v2033_v33 }
 0x9b4   :  { %v2010_v19 = vpop.xlane.xlu1 %2009  ;;  %v2004_v23 = vpop.xlane.xlu0 %2003 }
 0x9b5   :  { %v2035_v44 = vsub.f32 %v3908_v39, %v2010_v19  ;;  %v2032_v25 = vsub.f32 %v3911_v55, %v2004_v23  ;;  %3167 = vpow2.f32 %v2049_v46 }
 0x9b6   :  { %3169 = vpow2.f32 %v2053_v9 }
 0x9b7   :  { %v2051_v42 = vmul.f32 1.442695, %v2032_v25  ;;  %v2057_v60 = vmul.f32 1.442695, %v2035_v44 }
 0x9b8   :  { %v2014_v34 = vpop.xlane.xlu1 %2013  ;;  %v2008_v8 = vpop.xlane.xlu0 %2007 }
 0x9b9   :  { %v2037_v14 = vsub.f32 %v3918_v50, %v2014_v34  ;;  %v2034_v38 = vsub.f32 %v3921_v28, %v2008_v8  ;;  %3171 = vpow2.f32 %v2051_v42 }
 0x9ba   :  { %3173 = vpow2.f32 %v2057_v60 }
 0x9bb   :  { %v2055_v1 = vmul.f32 1.442695, %v2034_v38  ;;  %v2061_v40 = vmul.f32 1.442695, %v2037_v14 }
 0x9bc   :  { %v2018_v48 = vpop.xlane.xlu1 %2017  ;;  %v2012_v15 = vpop.xlane.xlu0 %2011 }
 0x9bd   :  { %v2039_v39 = vsub.f32 %v3929_v43, %v2018_v48  ;;  %v2036_v16 = vsub.f32 %v1988_v61, %v2012_v15  ;;  %3175 = vpow2.f32 %v2055_v1 }
 0x9be   :  { %v3164_v55 = vpop.eup %3163  ;;  %3177 = vpow2.f32 %v2061_v40 }
 0x9bf   :  { %v3166_v45 = vpop.eup %3165  ;;  %v2059_v56 = vmul.f32 1.442695, %v2036_v16  ;;  %2079 = vadd.xlane.f32.xlu0 %v3164_v55  ;;  %v2065_v28 = vmul.f32 1.442695, %v2039_v39  ;;  %v3975_v39 = vrot.slane %v3874_v11, %v3548_v63 }
 0x9c0   :  { %2077 = vadd.xlane.f32.xlu1 %v3166_v45  ;;  %v2022_v59 = vpop.xlane.xlu1 %2021  ;;  %v2016_v29 = vpop.xlane.xlu0 %2015  ;;  %v2125_v50 = vpack.c.bf16 %v3164_v55, %v3166_v45 }
 0x9c1   :  { %v2041_v12 = vsub.f32 %v3935_v53, %v2022_v59  ;;  %v2038_v54 = vsub.f32 %v3938_v24, %v2016_v29  ;;  %3179 = vpow2.f32 %v2059_v56 }
 0x9c2   :  { %2906 = vmatprep.mubr.bf16.mxu0 %v2125_v50  ;;  %v3168_v31 = vpop.eup %3167  ;;  %3181 = vpow2.f32 %v2065_v28 }
 0x9c3   :  { %v2063_v17 = vmul.f32 1.442695, %v2038_v54  ;;  %v2069_v20 = vmul.f32 1.442695, %v2041_v12  ;;  %v3170_v41 = vpop.eup %3169 }
 0x9c4   :  { %2081 = vadd.xlane.f32.xlu1 %v3168_v31  ;;  %v2026_v52 = vpop.xlane.xlu1 %2025  ;;  %v2020_v49 = vpop.xlane.xlu0 %2019 }
 0x9c5   :  { %v2040_v32 = vsub.f32 %v3946_v5, %v2020_v49  ;;  %3183 = vpow2.f32 %v2063_v17  ;;  %v2043_v43 = vsub.f32 %v3943_v58, %v2026_v52 }
 0x9c6   :  { %v3172_v61 = vpop.eup %3171  ;;  %3185 = vpow2.f32 %v2069_v20 }
 0x9c7   :  { %v2067_v26 = vmul.f32 1.442695, %v2040_v32  ;;  %2083 = vadd.xlane.f32.xlu0 %v3172_v61  ;;  %v2126_v62 = vpack.c.bf16 %v3172_v61, %v3168_v31  ;;  %v3174_v27 = vpop.eup %3173  ;;  %v2073_v53 = vmul.f32 1.442695, %v2043_v43 }
 0x9c8   :  { %2085 = vadd.xlane.f32.xlu1 %v3170_v41  ;;  %v2024_v13 = vpop.xlane.xlu0 %2023 }
 0x9c9   :  { %v2042_v36 = vsub.f32 %v3951_v6, %v2024_v13  ;;  %3187 = vpow2.f32 %v2067_v26  ;;  %2907 = vmatmul.mubr.bf16.vlgmr.msra.gmra.mxu0 %v2126_v62 }
 0x9ca   :  { %v3176_v24 = vpop.eup %3175 }
 0x9cb   :  { %v2071_v30 = vmul.f32 1.442695, %v2042_v36  ;;  %2087 = vadd.xlane.f32.xlu0 %v3176_v24  ;;  %v2127_v5 = vpack.c.bf16 %v3176_v24, %v3170_v41  ;;  %v3178_v0 = vpop.eup %3177 }
 0x9cc   :  { %2089 = vadd.xlane.f32.xlu1 %v3174_v27  ;;  %v2028_v57 = vpop.xlane.xlu0 %2027 }
 0x9cd   :  { %3189 = vpow2.f32 %v2071_v30  ;;  %v2044_v58 = vsub.f32 %v3955_v18, %v2028_v57  ;;  %2910 = vmatprep.mubr.bf16.mxu0 %v2127_v5 }
 0x9ce   :  { %3191 = vpow2.f32 %v2073_v53  ;;  %v3180_v37 = vpop.eup %3179 }
 0x9cf   :  { %v2075_v7 = vmul.f32 1.442695, %v2044_v58  ;;  %2091 = vadd.xlane.f32.xlu0 %v3180_v37  ;;  %v2128_v6 = vpack.c.bf16 %v3180_v37, %v3174_v27  ;;  %v3182_v21 = vpop.eup %3181 }
 0x9d0   :  { %2093 = vadd.xlane.f32.xlu1 %v3178_v0 }
 0x9d1   :  { %3193 = vpow2.f32 %v2075_v7  ;;  %2911 = vmatmul.mubr.bf16.gmra.mxu0 %v2128_v6 }
 0x9d2   :  { %v3184_v22 = vpop.eup %3183 }
 0x9d3   :  { %2095 = vadd.xlane.f32.xlu0 %v3184_v22  ;;  %v2129_v35 = vpack.c.bf16 %v3184_v22, %v3178_v0  ;;  %v3186_v2 = vpop.eup %3185 }
 0x9d4   :  { %2097 = vadd.xlane.f32.xlu1 %v3182_v21 }
 0x9d5   :  { %2914 = vmatprep.mubr.bf16.mxu0 %v2129_v35 }
 0x9d6   :  { %v3188_v4 = vpop.eup %3187 }
 0x9d7   :  { %2099 = vadd.xlane.f32.xlu0 %v3188_v4  ;;  %v2130_v18 = vpack.c.bf16 %v3188_v4, %v3182_v21 }
 0x9d8   :  { %2101 = vadd.xlane.f32.xlu1 %v3186_v2 }
 0x9d9   :  { %2915 = vmatmul.mubr.bf16.gmra.mxu0 %v2130_v18 }
 0x9da   :  { %v3190_v3 = vpop.eup %3189 }
 0x9db   :  { %v3192_v47 = vpop.eup %3191  ;;  %v2131_v51 = vpack.c.bf16 %v3190_v3, %v3186_v2  ;;  %2103 = vadd.xlane.f32.xlu0 %v3190_v3 }
 0x9dc   :  { %2105 = vadd.xlane.f32.xlu1 %v3192_v47 }
 0x9dd   :  { %2918 = vmatprep.mubr.bf16.mxu0 %v2131_v51 }
 0x9de   :  { %v3194_v33 = vpop.eup %3193 }
 0x9df   :  { %v2132_v10 = vpack.c.bf16 %v3194_v33, %v3192_v47  ;;  %2107 = vadd.xlane.f32.xlu0 %v3194_v33 }
 0x9e1   :  { %2919 = vmatmul.mubr.bf16.gmra.mxu0 %v2132_v10 }
 0xa48   :  { %v2080_v19 = vpop.xlane.xlu0 %2079 }
 0xa49   :  { %v2078_v46 = vpop.xlane.xlu1 %2077 }
 0xa4d   :  { %v2082_v23 = vpop.xlane.xlu1 %2081 }
 0xa4e   :  { %3195 = vrcp.f32 %v2082_v23 }
 0xa4f   :  { %3197 = vrcp.f32 %v2078_v46 }
 0xa50   :  { %v2084_v9 = vpop.xlane.xlu0 %2083 }
 0xa51   :  { %v2086_v44 = vpop.xlane.xlu1 %2085  ;;  %3199 = vrcp.f32 %v2084_v9 }
 0xa52   :  { %3201 = vrcp.f32 %v2080_v19 }
 0xa54   :  { %v2088_v25 = vpop.xlane.xlu0 %2087 }
 0xa55   :  { %v2090_v42 = vpop.xlane.xlu1 %2089 }
 0xa56   :  { %3203 = vrcp.f32 %v2090_v42 }
 0xa57   :  { %3205 = vrcp.f32 %v2086_v44 }
 0xa58   :  { %v2092_v34 = vpop.xlane.xlu0 %2091 }
 0xa59   :  { %v2094_v8 = vpop.xlane.xlu1 %2093  ;;  %3207 = vrcp.f32 %v2092_v34 }
 0xa5a   :  { %3209 = vrcp.f32 %v2088_v25 }
 0xa5b   :  { %v3196_v48 = vpop.eup %3195 }
 0xa5c   :  { %v2096_v60 = vpop.xlane.xlu0 %2095  ;;  %v3198_v40 = vpop.eup %3197 }
 0xa5d   :  { %v2098_v14 = vpop.xlane.xlu1 %2097 }
 0xa5e   :  { %v3200_v55 = vpop.eup %3199  ;;  %3211 = vrcp.f32 %v2098_v14 }
 0xa5f   :  { %v3202_v50 = vpop.eup %3201  ;;  %3213 = vrcp.f32 %v2094_v8 }
 0xa60   :  { %v2100_v38 = vpop.xlane.xlu0 %2099 }
 0xa61   :  { %v2102_v45 = vpop.xlane.xlu1 %2101  ;;  %3215 = vrcp.f32 %v2100_v38 }
 0xa62   :  { %3217 = vrcp.f32 %v2096_v60 }
 0xa63   :  { %v3204_v20 = vpop.eup %3203 }
 0xa64   :  { %v2104_v28 = vpop.xlane.xlu0 %2103  ;;  %v3206_v43 = vpop.eup %3205 }
 0xa65   :  { %v2106_v32 = vpop.xlane.xlu1 %2105 }
 0xa66   :  { %v3208_v13 = vpop.eup %3207  ;;  %3219 = vrcp.f32 %v2106_v32 }
 0xa67   :  { %v3210_v24 = vpop.eup %3209  ;;  %3221 = vrcp.f32 %v2102_v45 }
 0xa68   :  { %v2108_v62 = vpop.xlane.xlu0 %2107 }
 0xa69   :  { %3223 = vrcp.f32 %v2108_v62 }
 0xa6a   :  { %3225 = vrcp.f32 %v2104_v28 }
 0xa6b   :  { %v3212_v21 = vpop.eup %3211 }
 0xa6c   :  { %v3214_v35 = vpop.eup %3213 }
 0xa6e   :  { %v3216_v18 = vpop.eup %3215 }
 0xa6f   :  { %v3218_v33 = vpop.eup %3217 }
 0xa73   :  { %v3220_v34 = vpop.eup %3219 }
 0xa74   :  { %v3222_v60 = vpop.eup %3221 }
 0xa89   :  { %v2908_v1 = vpop.f32.mrf.mxu0 }
 0xa8a   :  { %v2232_v16 = vmul.f32 %v3196_v48, %v2908_v1  ;;  %v3224_v1 = vpop.eup %3223 }
 0xa8b   :  { %v2167_v15 = vpop.f32.mrf.mxu0 }
 0xa8c   :  { %v2230_v59 = vmul.f32 %v3198_v40, %v2167_v15  ;;  %v2252_v54 = vadd.f32 %v3975_v39, %v2232_v16  ;;  %v3226_v16 = vpop.eup %3225 }
 0xa8d   :  { %v2909_v56 = vpop.f32.mrf.mxu0 }
 0xa8e   :  { %v2233_v29 = vmul.f32 %v3200_v55, %v2909_v56  ;;  %v2250_v63 = vadd.f32 %v3975_v39, %v2230_v59 }
 0xa8f   :  { %v2170_v12 = vpop.f32.mrf.mxu0 }
 0xa90   :  { %v2253_v31 = vadd.f32 %v3975_v39, %v2233_v29  ;;  %v2231_v17 = vmul.f32 %v3202_v50, %v2170_v12 }
 0xa91   :  { %v2912_v52 = vpop.f32.mrf.mxu0 }
 0xa92   :  { %v2501_v11 = vpack.c.bf16 %v2253_v31, %v2252_v54  ;;  %v2251_v49 = vadd.f32 %v3975_v39, %v2231_v17  ;;  %v2236_v26 = vmul.f32 %v3204_v20, %v2912_v52 }
 0xa93   :  { %v2183_v41 = vpop.f32.mrf.mxu0 }
 0xa94   :  { %2540 = vst [vmem:[#allocation10 + $0x8] sm:$0xff] %v2501_v11   ;;  %v2496_v61 = vpack.c.bf16 %v2251_v49, %v2250_v63  ;;  %v2234_v27 = vmul.f32 %v3206_v43, %v2183_v41  ;;  %v2256_v57 = vadd.f32 %v3975_v39, %v2236_v26 }
 0xa95   :  { %v2913_v36 = vpop.f32.mrf.mxu0 }
 0xa96   :  { %2497 = vst [vmem:[#allocation10] sm:$0xff] %v2496_v61   ;;  %v2237_v53 = vmul.f32 %v3208_v13, %v2913_v36  ;;  %v2254_v37 = vadd.f32 %v3975_v39, %v2234_v27 }
 0xa97   :  { %v2186_v30 = vpop.f32.mrf.mxu0 }
 0xa98   :  { %v2257_v5 = vadd.f32 %v3975_v39, %v2237_v53  ;;  %v2235_v58 = vmul.f32 %v3210_v24, %v2186_v30 }
 0xa99   :  { %v2916_v0 = vpop.f32.mrf.mxu0 }
 0xa9a   :  { %v2511_v7 = vpack.c.bf16 %v2257_v5, %v2256_v57  ;;  %v2255_v6 = vadd.f32 %v3975_v39, %v2235_v58  ;;  %v2240_v4 = vmul.f32 %v3212_v21, %v2916_v0 }
 0xa9b   :  { %v2199_v22 = vpop.f32.mrf.mxu0 }
 0xa9c   :  { %2542 = vst [vmem:[#allocation10 + $0x18] sm:$0xff] %v2511_v7   ;;  %v2506_v2 = vpack.c.bf16 %v2255_v6, %v2254_v37  ;;  %v2238_v47 = vmul.f32 %v3214_v35, %v2199_v22  ;;  %v2260_v46 = vadd.f32 %v3975_v39, %v2240_v4 }
 0xa9d   :  { %v2917_v3 = vpop.f32.mrf.mxu0 }
 0xa9e   :  { %2541 = vst [vmem:[#allocation10 + $0x10] sm:$0xff] %v2506_v2   ;;  %v2241_v51 = vmul.f32 %v3216_v18, %v2917_v3  ;;  %v2258_v44 = vadd.f32 %v3975_v39, %v2238_v47 }
 0xa9f   :  { %v2202_v10 = vpop.f32.mrf.mxu0 }
 0xaa0   :  { %v2261_v19 = vadd.f32 %v3975_v39, %v2241_v51  ;;  %v2239_v23 = vmul.f32 %v3218_v33, %v2202_v10 }
 0xaa1   :  { %v2920_v9 = vpop.f32.mrf.mxu0 }
 0xaa2   :  { %v2521_v25 = vpack.c.bf16 %v2261_v19, %v2260_v46  ;;  %v2259_v42 = vadd.f32 %v3975_v39, %v2239_v23  ;;  %v2244_v38 = vmul.f32 %v3220_v34, %v2920_v9 }
 0xaa3   :  { %v2215_v8 = vpop.f32.mrf.mxu0 }
 0xaa4   :  { %2544 = vst [vmem:[#allocation10 + $0x28] sm:$0xff] %v2521_v25   ;;  %v2516_v14 = vpack.c.bf16 %v2259_v42, %v2258_v44  ;;  %v2242_v15 = vmul.f32 %v3222_v60, %v2215_v8  ;;  %v2264_v45 = vadd.f32 %v3975_v39, %v2244_v38 }
 0xaa5   :  { %v2921_v48 = vpop.f32.mrf.mxu0 }
 0xaa6   :  { %2543 = vst [vmem:[#allocation10 + $0x20] sm:$0xff] %v2516_v14   ;;  %v2245_v40 = vmul.f32 %v3224_v1, %v2921_v48  ;;  %v2262_v29 = vadd.f32 %v3975_v39, %v2242_v15 }
 0xaa7   :  { %v2218_v55 = vpop.f32.mrf.mxu0 }
 0xaa8   :  { %v2265_v56 = vadd.f32 %v3975_v39, %v2245_v40  ;;  %v2243_v59 = vmul.f32 %v3226_v16, %v2218_v55 }
 0xaaa   :  { %v2531_v50 = vpack.c.bf16 %v2265_v56, %v2264_v45  ;;  %v2263_v28 = vadd.f32 %v3975_v39, %v2243_v59 }
 0xaac   :  { %2546 = vst [vmem:[#allocation10 + $0x38] sm:$0xff] %v2531_v50   ;;  %v2526_v12 = vpack.c.bf16 %v2263_v28, %v2262_v29 }
 0xaae   :  { %2545 = vst [vmem:[#allocation10 + $0x30] sm:$0xff] %v2526_v12  }
 0xaaf   :  { %3318 = shalt.err (!%p3315_p10)
}
 0xab0   :  { %2357 = dma.vmem_to_hbm [thread:$0]  %s2352_s3, 1024, %s4003_s4, [#allocation4], %s3337_s20, %s3337_s20, %s3338_s21  }
 0xab1   :  { %3333 = dma.done.wait [#allocation4], 1024  }
 0xab2   :  { %3334 = vsyncadd [#allocation4], 4294966272 }
 0xab3   :  { %2361 = vsyncpa [#allocation3], 1 }
 0xab4   :  { %2362 = vsyncpa [#allocation6], 1 }
 0xab5   :  { %2363 = vsyncpa [#allocation9], 1 }
 0xab6   :  { %2364 = vsyncpa [#allocation4], 1 }

</bundles_post_ra>
